<compile_context>
chip_gen: v5e
topology: v5e:2x2
jax: 0.10.0
libtpu: 0.0.40
codegen_flags: <defaults>
</compile_context>

<pallas_src>
import jax
import jax.numpy as jnp
from jax.experimental import pallas as pl
from jax.experimental.pallas import tpu as pltpu


def _fold_bn(gamma, beta, mean, var, eps=1e-5):
    scale = gamma / jnp.sqrt(var + eps)
    shift = beta - mean * scale
    return scale.astype(jnp.float32), shift.astype(jnp.float32)


def down_forward(x_nchw, params):
    n, c, h, w = x_nchw.shape
    h2, w2 = h // 2, w // 2          # requires even H, W (PyTorch MaxPool2d(2) floors)
    m = h2 * w2                      # flattened pooled spatial size per batch element
    out_c = params["w1"].shape[0]
    pad0 = w2 + 1                    # zero rows before/after the flattened image
    pad_rows = m + 2 * pad0

    # Wrapper layout plumbing: NCHW -> NHWC, expose the 2x2 pool taps on a row-pair dim
    # and the lane dim, cast to bf16 so the kernel's input DMA is half-width.
    xv = (jnp.transpose(x_nchw, (0, 2, 3, 1))
          .reshape(n, h2, 2, w2, 2 * c).astype(jnp.bfloat16))

    # Fold BN scale into the conv weights; (Cout,Cin,3,3) -> (9*Cin, Cout) bf16 so each
    # conv is a single MXU dot against the (M, 9*Cin) im2col matrix.
    sc1, of1 = _fold_bn(params["g1"], params["b1"], params["m1"], params["v1"])
    sc2, of2 = _fold_bn(params["g2"], params["b2"], params["m2"], params["v2"])
    wk1 = (jnp.transpose(params["w1"], (2, 3, 1, 0)).reshape(9, c, out_c)
           * sc1).astype(jnp.bfloat16).reshape(9 * c, out_c)
    wk2 = (jnp.transpose(params["w2"], (2, 3, 1, 0)).reshape(9, out_c, out_c)
           * sc2).astype(jnp.bfloat16).reshape(9 * out_c, out_c)
    sh1 = of1.reshape(1, out_c)
    sh2 = of2.reshape(1, out_c)

    def kernel(x_ref, w1_ref, sh1_ref, w2_ref, sh2_ref, o_ref,
               pp_ref, y1p_ref, im1_ref, im2_ref):
        f32 = jnp.float32

        # ------------------------ fused 2x2 max pool (bf16 VPU) ----------------------
        vm = jnp.maximum(x_ref[0, :, 0], x_ref[0, :, 1])        # (h2, w2, 2c)
        pooled = jnp.maximum(vm[:, :, :c], vm[:, :, c:])         # (h2, w2, c)

        # Zero only the pad rows; the interior [pad0, pad0+m) is fully overwritten.
        pp_ref[0:pad0, :] = jnp.zeros((pad0, c), f32)
        pp_ref[pad0 + m:pad_rows, :] = jnp.zeros((pad0, c), f32)
        y1p_ref[0:pad0, :] = jnp.zeros((pad0, out_c), f32)
        y1p_ref[pad0 + m:pad_rows, :] = jnp.zeros((pad0, out_c), f32)

        # One contiguous store of all pooled rows (target rows are contiguous).
        pp_ref[pad0:pad0 + m, :] = pooled.reshape(m, c).astype(f32)

        # In-kernel left/right border masks: the flat layout wraps rows, so kx=0 / kx=2
        # taps must be zeroed at the image borders.
        col = jax.lax.broadcasted_iota(jnp.int32, (m, 1), 0) % w2
        mask_l = col >= 1
        mask_r = col <= (w2 - 2)

        # -------------- 3x3 conv (im2col + ONE MXU dot) + BN shift + ReLU ------------
        def conv3x3(src_ref, im_ref, cin, w_ref, shift_ref):
            for ky in range(3):
                for kx in range(3):
                    t = ky * 3 + kx
                    start = ky * w2 + kx                    # shifted-window start
                    tap = src_ref[start:start + m, :]
                    if kx == 0:
                        tap = jnp.where(mask_l, tap, 0.0)
                    elif kx == 2:
                        tap = jnp.where(mask_r, tap, 0.0)
                    im_ref[:, t * cin:(t + 1) * cin] = tap
            acc = jnp.dot(im_ref[...].astype(jnp.bfloat16), w_ref[...],
                          preferred_element_type=f32)
            return jnp.maximum(acc + shift_ref[...], 0.0)    # folded-BN shift + ReLU

        y1 = conv3x3(pp_ref, im1_ref, c, w1_ref, sh1_ref)        # (m, out_c), VMEM only
        y1p_ref[pad0:pad0 + m, :] = y1
        y2 = conv3x3(y1p_ref, im2_ref, out_c, w2_ref, sh2_ref)   # (m, out_c)

        # Lane-dense NCHW store: (out_c, m) with the spatial dim on lanes.
        o_ref[0] = y2.T.astype(o_ref.dtype)

    flops = 2 * n * m * 9 * (c + out_c) * out_c
    bytes_accessed = (xv.size * 2 + n * m * out_c * 4
                      + wk1.size * 2 + wk2.size * 2 + (sh1.size + sh2.size) * 4)

    out = pl.pallas_call(
        kernel,
        out_shape=jax.ShapeDtypeStruct((n, out_c, m), jnp.float32),
        grid_spec=pltpu.PrefetchScalarGridSpec(
            num_scalar_prefetch=0,
            grid=(n,),     # 1 batch element / step keeps >= 2 parallel steps (v7x)
            in_specs=[
                pl.BlockSpec((1, h2, 2, w2, 2 * c), lambda b: (b, 0, 0, 0, 0)),
                pl.BlockSpec((9 * c, out_c), lambda b: (0, 0)),
                pl.BlockSpec((1, out_c), lambda b: (0, 0)),
                pl.BlockSpec((9 * out_c, out_c), lambda b: (0, 0)),
                pl.BlockSpec((1, out_c), lambda b: (0, 0)),
            ],
            out_specs=pl.BlockSpec((1, out_c, m), lambda b: (b, 0, 0)),
            scratch_shapes=[
                pltpu.VMEM((pad_rows, c), jnp.float32),      # padded pooled image
                pltpu.VMEM((pad_rows, out_c), jnp.float32),  # padded conv1 output
                pltpu.VMEM((m, 9 * c), jnp.float32),         # im2col for conv1
                pltpu.VMEM((m, 9 * out_c), jnp.float32),     # im2col for conv2
            ],
        ),
        compiler_params=pltpu.CompilerParams(
            dimension_semantics=("parallel",),
        ),
        cost_estimate=pl.CostEstimate(flops=flops, transcendentals=0,
                                      bytes_accessed=bytes_accessed),
    )(xv, wk1, sh1, wk2, sh2)

    # (N, Cout, M) -> NCHW: pure reshape, no post-kernel transpose pass.
    return out.reshape(n, out_c, h2, w2)


def init_params(key, in_c, out_c):
    ks = jax.random.split(key, 10)
    return {
        "w1": 0.1 * jax.random.normal(ks[0], (out_c, in_c, 3, 3), jnp.float32),
        "w2": 0.1 * jax.random.normal(ks[1], (out_c, out_c, 3, 3), jnp.float32),
        "g1": 1.0 + 0.1 * jax.random.normal(ks[2], (out_c,), jnp.float32),
        "b1": 0.1 * jax.random.normal(ks[3], (out_c,), jnp.float32),
        "m1": 0.1 * jax.random.normal(ks[4], (out_c,), jnp.float32),
        "v1": 0.5 + jnp.abs(jax.random.normal(ks[5], (out_c,), jnp.float32)),
        "g2": 1.0 + 0.1 * jax.random.normal(ks[6], (out_c,), jnp.float32),
        "b2": 0.1 * jax.random.normal(ks[7], (out_c,), jnp.float32),
        "m2": 0.1 * jax.random.normal(ks[8], (out_c,), jnp.float32),
        "v2": 0.5 + jnp.abs(jax.random.normal(ks[9], (out_c,), jnp.float32)),
    }


if __name__ == "__main__":
    key = jax.random.PRNGKey(0)
    kdata, kparam = jax.random.split(key)

    N, IN_C, OUT_C, H, W = 2, 4, 8, 16, 16
    x = jax.random.normal(kdata, (N, IN_C, H, W), jnp.float32)   # NCHW like PyTorch
    params = init_params(kparam, IN_C, OUT_C)

    out = jax.jit(down_forward)(x, params)
    out = jax.block_until_ready(out)

    assert out.shape == (N, OUT_C, H // 2, W // 2), out.shape
    assert out.dtype == jnp.float32
    assert bool(jnp.all(jnp.isfinite(out)))
    assert bool(jnp.all(out >= 0.0))   # ReLU output
    print("KERNEL_OK")
</pallas_src>

<mosaic_0001>
module attributes {stable_mosaic.version = 11 : i64} {
  func.func @kernel(%arg0: i32, %arg1: memref<1x8x2x8x8xbf16, #tpu.memory_space<vmem>>, %arg2: memref<36x8xbf16, #tpu.memory_space<vmem>>, %arg3: memref<1x8xf32, #tpu.memory_space<vmem>>, %arg4: memref<72x8xbf16, #tpu.memory_space<vmem>>, %arg5: memref<1x8xf32, #tpu.memory_space<vmem>>, %arg6: memref<1x8x64xf32, #tpu.memory_space<vmem>>, %arg7: memref<82x4xf32, #tpu.memory_space<vmem>>, %arg8: memref<82x8xf32, #tpu.memory_space<vmem>>, %arg9: memref<64x36xf32, #tpu.memory_space<vmem>>, %arg10: memref<64x72xf32, #tpu.memory_space<vmem>>) attributes {dimension_semantics = [#tpu.dimension_semantics<parallel>], iteration_bounds = array<i64: 2>, scalar_prefetch = 0 : i64, scratch_operands = 4 : i64, tpu.core_type = #tpu.core_type<tc>, window_params = [{transform_indices = @transform_0, window_bounds = array<i64: 1, 8, 2, 8, 8>}, {pipeline_mode = #tpu.pipeline_mode<synchronous>, transform_indices = @transform_1, window_bounds = array<i64: 36, 8>}, {pipeline_mode = #tpu.pipeline_mode<synchronous>, transform_indices = @transform_2, window_bounds = array<i64: 1, 8>}, {pipeline_mode = #tpu.pipeline_mode<synchronous>, transform_indices = @transform_3, window_bounds = array<i64: 72, 8>}, {pipeline_mode = #tpu.pipeline_mode<synchronous>, transform_indices = @transform_4, window_bounds = array<i64: 1, 8>}, {transform_indices = @transform_5, window_bounds = array<i64: 1, 8, 64>}]} {
    %c0 = arith.constant 0 : index
    %c0_0 = arith.constant 0 : index
    %c0_1 = arith.constant 0 : index
    %c0_2 = arith.constant 0 : index
    %c0_3 = arith.constant 0 : index
    %0 = vector.load %arg1[%c0, %c0_0, %c0_1, %c0_2, %c0_3] : memref<1x8x2x8x8xbf16, #tpu.memory_space<vmem>>, vector<1x8x1x8x8xbf16>
    %1 = vector.shape_cast %0 : vector<1x8x1x8x8xbf16> to vector<8x8x8xbf16>
    %c0_4 = arith.constant 0 : index
    %c0_5 = arith.constant 0 : index
    %c1 = arith.constant 1 : index
    %c0_6 = arith.constant 0 : index
    %c0_7 = arith.constant 0 : index
    %2 = vector.load %arg1[%c0_4, %c0_5, %c1, %c0_6, %c0_7] : memref<1x8x2x8x8xbf16, #tpu.memory_space<vmem>>, vector<1x8x1x8x8xbf16>
    %3 = vector.shape_cast %2 : vector<1x8x1x8x8xbf16> to vector<8x8x8xbf16>
    %4 = arith.maximumf %1, %3 : vector<8x8x8xbf16>
    %5 = vector.extract_strided_slice %4 {offsets = [0, 0, 0], sizes = [8, 8, 4], strides = [1, 1, 1]} : vector<8x8x8xbf16> to vector<8x8x4xbf16>
    %6 = vector.extract_strided_slice %4 {offsets = [0, 0, 4], sizes = [8, 8, 4], strides = [1, 1, 1]} : vector<8x8x8xbf16> to vector<8x8x4xbf16>
    %7 = arith.maximumf %5, %6 : vector<8x8x4xbf16>
    %cst = arith.constant 0.000000e+00 : f32
    %8 = vector.broadcast %cst : f32 to vector<9x4xf32>
    %c0_8 = arith.constant 0 : index
    %c0_9 = arith.constant 0 : index
    %9 = vector.load %arg7[%c0_8, %c0_9] : memref<82x4xf32, #tpu.memory_space<vmem>>, vector<9x4xf32>
    tpu.vector_store %arg7[%c0_8, %c0_9], %8 {strides = array<i32>} : memref<82x4xf32, #tpu.memory_space<vmem>>, vector<9x4xf32>,
    %cst_10 = arith.constant 0.000000e+00 : f32
    %10 = vector.broadcast %cst_10 : f32 to vector<9x4xf32>
    %c73 = arith.constant 73 : index
    %c0_11 = arith.constant 0 : index
    %11 = vector.load %arg7[%c73, %c0_11] : memref<82x4xf32, #tpu.memory_space<vmem>>, vector<9x4xf32>
    tpu.vector_store %arg7[%c73, %c0_11], %10 {strides = array<i32>} : memref<82x4xf32, #tpu.memory_space<vmem>>, vector<9x4xf32>,
    %cst_12 = arith.constant 0.000000e+00 : f32
    %12 = vector.broadcast %cst_12 : f32 to vector<9x8xf32>
    %c0_13 = arith.constant 0 : index
    %c0_14 = arith.constant 0 : index
    %13 = vector.load %arg8[%c0_13, %c0_14] : memref<82x8xf32, #tpu.memory_space<vmem>>, vector<9x8xf32>
    tpu.vector_store %arg8[%c0_13, %c0_14], %12 {strides = array<i32>} : memref<82x8xf32, #tpu.memory_space<vmem>>, vector<9x8xf32>,
    %cst_15 = arith.constant 0.000000e+00 : f32
    %14 = vector.broadcast %cst_15 : f32 to vector<9x8xf32>
    %c73_16 = arith.constant 73 : index
    %c0_17 = arith.constant 0 : index
    %15 = vector.load %arg8[%c73_16, %c0_17] : memref<82x8xf32, #tpu.memory_space<vmem>>, vector<9x8xf32>
    tpu.vector_store %arg8[%c73_16, %c0_17], %14 {strides = array<i32>} : memref<82x8xf32, #tpu.memory_space<vmem>>, vector<9x8xf32>,
    %16 = vector.shape_cast %7 : vector<8x8x4xbf16> to vector<64x4xbf16>
    %17 = arith.extf %16 : vector<64x4xbf16> to vector<64x4xf32>
    %c9 = arith.constant 9 : index
    %c0_18 = arith.constant 0 : index
    %18 = vector.load %arg7[%c9, %c0_18] : memref<82x4xf32, #tpu.memory_space<vmem>>, vector<64x4xf32>
    tpu.vector_store %arg7[%c9, %c0_18], %17 {strides = array<i32>} : memref<82x4xf32, #tpu.memory_space<vmem>>, vector<64x4xf32>,
    %19 = tpu.iota {dimensions = array<i32: 0>} : vector<64x1xi32>
    %c8_i32 = arith.constant 8 : i32
    %c0_i32 = arith.constant 0 : i32
    %20 = arith.cmpi eq, %c8_i32, %c0_i32 : i32
    %c1_i32 = arith.constant 1 : i32
    %21 = arith.select %20, %c1_i32, %c8_i32 : i32
    %22 = vector.broadcast %21 : i32 to vector<64x1xi32>
    %23 = arith.remsi %19, %22 : vector<64x1xi32>
    %c0_i32_19 = arith.constant 0 : i32
    %24 = vector.broadcast %c0_i32_19 : i32 to vector<64x1xi32>
    %25 = arith.cmpi ne, %23, %24 : vector<64x1xi32>
    %c0_i32_20 = arith.constant 0 : i32
    %26 = vector.broadcast %c0_i32_20 : i32 to vector<64x1xi32>
    %27 = arith.cmpi slt, %23, %26 : vector<64x1xi32>
    %c0_i32_21 = arith.constant 0 : i32
    %28 = arith.cmpi slt, %21, %c0_i32_21 : i32
    %29 = vector.broadcast %28 : i1 to vector<64x1xi1>
    %30 = vector.broadcast %29 : vector<64x1xi1> to vector<64x1xi1>
    %31 = arith.xori %27, %30 : vector<64x1xi1>
    %32 = arith.andi %31, %25 : vector<64x1xi1>
    %33 = vector.broadcast %21 : i32 to vector<64x1xi32>
    %34 = arith.addi %23, %33 : vector<64x1xi32>
    %35 = arith.select %32, %34, %23 : vector<64x1xi1>, vector<64x1xi32>
    %c1_i32_22 = arith.constant 1 : i32
    %36 = vector.broadcast %c1_i32_22 : i32 to vector<64x1xi32>
    %37 = arith.cmpi sge, %35, %36 : vector<64x1xi32>
    %c6_i32 = arith.constant 6 : i32
    %38 = vector.broadcast %c6_i32 : i32 to vector<64x1xi32>
    %39 = arith.cmpi sle, %35, %38 : vector<64x1xi32>
    %c0_23 = arith.constant 0 : index
    %c0_24 = arith.constant 0 : index
    %40 = vector.load %arg7[%c0_23, %c0_24] : memref<82x4xf32, #tpu.memory_space<vmem>>, vector<64x4xf32>
    %cst_25 = arith.constant 0.000000e+00 : f32
    %41 = vector.shape_cast %37 : vector<64x1xi1> to vector<64x1xi1>
    %42 = vector.broadcast %41 : vector<64x1xi1> to vector<64x4xi1>
    %43 = vector.broadcast %cst_25 : f32 to vector<64x4xf32>
    %44 = arith.select %42, %40, %43 : vector<64x4xi1>, vector<64x4xf32>
    %c0_26 = arith.constant 0 : index
    %c0_27 = arith.constant 0 : index
    %45 = vector.load %arg9[%c0_26, %c0_27] : memref<64x36xf32, #tpu.memory_space<vmem>>, vector<64x4xf32>
    tpu.vector_store %arg9[%c0_26, %c0_27], %44 {strides = array<i32>} : memref<64x36xf32, #tpu.memory_space<vmem>>, vector<64x4xf32>,
    %c1_28 = arith.constant 1 : index
    %c0_29 = arith.constant 0 : index
    %46 = vector.load %arg7[%c1_28, %c0_29] : memref<82x4xf32, #tpu.memory_space<vmem>>, vector<64x4xf32>
    %c0_30 = arith.constant 0 : index
    %c4 = arith.constant 4 : index
    %47 = vector.load %arg9[%c0_30, %c4] : memref<64x36xf32, #tpu.memory_space<vmem>>, vector<64x4xf32>
    tpu.vector_store %arg9[%c0_30, %c4], %46 {strides = array<i32>} : memref<64x36xf32, #tpu.memory_space<vmem>>, vector<64x4xf32>,
    %c2 = arith.constant 2 : index
    %c0_31 = arith.constant 0 : index
    %48 = vector.load %arg7[%c2, %c0_31] : memref<82x4xf32, #tpu.memory_space<vmem>>, vector<64x4xf32>
    %cst_32 = arith.constant 0.000000e+00 : f32
    %49 = vector.shape_cast %39 : vector<64x1xi1> to vector<64x1xi1>
    %50 = vector.broadcast %49 : vector<64x1xi1> to vector<64x4xi1>
    %51 = vector.broadcast %cst_32 : f32 to vector<64x4xf32>
    %52 = arith.select %50, %48, %51 : vector<64x4xi1>, vector<64x4xf32>
    %c0_33 = arith.constant 0 : index
    %c8 = arith.constant 8 : index
    %53 = vector.load %arg9[%c0_33, %c8] : memref<64x36xf32, #tpu.memory_space<vmem>>, vector<64x4xf32>
    tpu.vector_store %arg9[%c0_33, %c8], %52 {strides = array<i32>} : memref<64x36xf32, #tpu.memory_space<vmem>>, vector<64x4xf32>,
    %c8_34 = arith.constant 8 : index
    %c0_35 = arith.constant 0 : index
    %54 = vector.load %arg7[%c8_34, %c0_35] : memref<82x4xf32, #tpu.memory_space<vmem>>, vector<64x4xf32>
    %cst_36 = arith.constant 0.000000e+00 : f32
    %55 = vector.shape_cast %37 : vector<64x1xi1> to vector<64x1xi1>
    %56 = vector.broadcast %55 : vector<64x1xi1> to vector<64x4xi1>
    %57 = vector.broadcast %cst_36 : f32 to vector<64x4xf32>
    %58 = arith.select %56, %54, %57 : vector<64x4xi1>, vector<64x4xf32>
    %c0_37 = arith.constant 0 : index
    %c12 = arith.constant 12 : index
    %59 = vector.load %arg9[%c0_37, %c12] : memref<64x36xf32, #tpu.memory_space<vmem>>, vector<64x4xf32>
    tpu.vector_store %arg9[%c0_37, %c12], %58 {strides = array<i32>} : memref<64x36xf32, #tpu.memory_space<vmem>>, vector<64x4xf32>,
    %c9_38 = arith.constant 9 : index
    %c0_39 = arith.constant 0 : index
    %60 = vector.load %arg7[%c9_38, %c0_39] : memref<82x4xf32, #tpu.memory_space<vmem>>, vector<64x4xf32>
    %c0_40 = arith.constant 0 : index
    %c16 = arith.constant 16 : index
    %61 = vector.load %arg9[%c0_40, %c16] : memref<64x36xf32, #tpu.memory_space<vmem>>, vector<64x4xf32>
    tpu.vector_store %arg9[%c0_40, %c16], %60 {strides = array<i32>} : memref<64x36xf32, #tpu.memory_space<vmem>>, vector<64x4xf32>,
    %c10 = arith.constant 10 : index
    %c0_41 = arith.constant 0 : index
    %62 = vector.load %arg7[%c10, %c0_41] : memref<82x4xf32, #tpu.memory_space<vmem>>, vector<64x4xf32>
    %cst_42 = arith.constant 0.000000e+00 : f32
    %63 = vector.shape_cast %39 : vector<64x1xi1> to vector<64x1xi1>
    %64 = vector.broadcast %63 : vector<64x1xi1> to vector<64x4xi1>
    %65 = vector.broadcast %cst_42 : f32 to vector<64x4xf32>
    %66 = arith.select %64, %62, %65 : vector<64x4xi1>, vector<64x4xf32>
    %c0_43 = arith.constant 0 : index
    %c20 = arith.constant 20 : index
    %67 = vector.load %arg9[%c0_43, %c20] : memref<64x36xf32, #tpu.memory_space<vmem>>, vector<64x4xf32>
    tpu.vector_store %arg9[%c0_43, %c20], %66 {strides = array<i32>} : memref<64x36xf32, #tpu.memory_space<vmem>>, vector<64x4xf32>,
    %c16_44 = arith.constant 16 : index
    %c0_45 = arith.constant 0 : index
    %68 = vector.load %arg7[%c16_44, %c0_45] : memref<82x4xf32, #tpu.memory_space<vmem>>, vector<64x4xf32>
    %cst_46 = arith.constant 0.000000e+00 : f32
    %69 = vector.shape_cast %37 : vector<64x1xi1> to vector<64x1xi1>
    %70 = vector.broadcast %69 : vector<64x1xi1> to vector<64x4xi1>
    %71 = vector.broadcast %cst_46 : f32 to vector<64x4xf32>
    %72 = arith.select %70, %68, %71 : vector<64x4xi1>, vector<64x4xf32>
    %c0_47 = arith.constant 0 : index
    %c24 = arith.constant 24 : index
    %73 = vector.load %arg9[%c0_47, %c24] : memref<64x36xf32, #tpu.memory_space<vmem>>, vector<64x4xf32>
    tpu.vector_store %arg9[%c0_47, %c24], %72 {strides = array<i32>} : memref<64x36xf32, #tpu.memory_space<vmem>>, vector<64x4xf32>,
    %c17 = arith.constant 17 : index
    %c0_48 = arith.constant 0 : index
    %74 = vector.load %arg7[%c17, %c0_48] : memref<82x4xf32, #tpu.memory_space<vmem>>, vector<64x4xf32>
    %c0_49 = arith.constant 0 : index
    %c28 = arith.constant 28 : index
    %75 = vector.load %arg9[%c0_49, %c28] : memref<64x36xf32, #tpu.memory_space<vmem>>, vector<64x4xf32>
    tpu.vector_store %arg9[%c0_49, %c28], %74 {strides = array<i32>} : memref<64x36xf32, #tpu.memory_space<vmem>>, vector<64x4xf32>,
    %c18 = arith.constant 18 : index
    %c0_50 = arith.constant 0 : index
    %76 = vector.load %arg7[%c18, %c0_50] : memref<82x4xf32, #tpu.memory_space<vmem>>, vector<64x4xf32>
    %cst_51 = arith.constant 0.000000e+00 : f32
    %77 = vector.shape_cast %39 : vector<64x1xi1> to vector<64x1xi1>
    %78 = vector.broadcast %77 : vector<64x1xi1> to vector<64x4xi1>
    %79 = vector.broadcast %cst_51 : f32 to vector<64x4xf32>
    %80 = arith.select %78, %76, %79 : vector<64x4xi1>, vector<64x4xf32>
    %c0_52 = arith.constant 0 : index
    %c32 = arith.constant 32 : index
    %81 = vector.load %arg9[%c0_52, %c32] : memref<64x36xf32, #tpu.memory_space<vmem>>, vector<64x4xf32>
    tpu.vector_store %arg9[%c0_52, %c32], %80 {strides = array<i32>} : memref<64x36xf32, #tpu.memory_space<vmem>>, vector<64x4xf32>,
    %c0_53 = arith.constant 0 : index
    %c0_54 = arith.constant 0 : index
    %82 = vector.load %arg9[%c0_53, %c0_54] : memref<64x36xf32, #tpu.memory_space<vmem>>, vector<64x36xf32>
    %83 = arith.truncf %82 : vector<64x36xf32> to vector<64x36xbf16>
    %c0_55 = arith.constant 0 : index
    %c0_56 = arith.constant 0 : index
    %84 = vector.load %arg2[%c0_55, %c0_56] : memref<36x8xbf16, #tpu.memory_space<vmem>>, vector<36x8xbf16>
    %cst_57 = arith.constant dense<0.000000e+00> : vector<64x8xf32>
    %85 = tpu.matmul %83, %84, %cst_57 {dimension_numbers = #tpu.dot_dimension_numbers<[1], [0], [0], [1], [0, 0, 1, 1], [], []>} : vector<64x36xbf16>, vector<36x8xbf16>, vector<64x8xf32> -> vector<64x8xf32>
    %c0_58 = arith.constant 0 : index
    %c0_59 = arith.constant 0 : index
    %86 = vector.load %arg3[%c0_58, %c0_59] : memref<1x8xf32, #tpu.memory_space<vmem>>, vector<1x8xf32>
    %87 = vector.broadcast %86 : vector<1x8xf32> to vector<64x8xf32>
    %88 = arith.addf %85, %87 : vector<64x8xf32>
    %cst_60 = arith.constant 0.000000e+00 : f32
    %89 = vector.broadcast %cst_60 : f32 to vector<64x8xf32>
    %90 = arith.maximumf %88, %89 : vector<64x8xf32>
    %c9_61 = arith.constant 9 : index
    %c0_62 = arith.constant 0 : index
    %91 = vector.load %arg8[%c9_61, %c0_62] : memref<82x8xf32, #tpu.memory_space<vmem>>, vector<64x8xf32>
    tpu.vector_store %arg8[%c9_61, %c0_62], %90 {strides = array<i32>} : memref<82x8xf32, #tpu.memory_space<vmem>>, vector<64x8xf32>,
    %c0_63 = arith.constant 0 : index
    %c0_64 = arith.constant 0 : index
    %92 = vector.load %arg8[%c0_63, %c0_64] : memref<82x8xf32, #tpu.memory_space<vmem>>, vector<64x8xf32>
    %cst_65 = arith.constant 0.000000e+00 : f32
    %93 = vector.shape_cast %37 : vector<64x1xi1> to vector<64x1xi1>
    %94 = vector.broadcast %93 : vector<64x1xi1> to vector<64x8xi1>
    %95 = vector.broadcast %cst_65 : f32 to vector<64x8xf32>
    %96 = arith.select %94, %92, %95 : vector<64x8xi1>, vector<64x8xf32>
    %c0_66 = arith.constant 0 : index
    %c0_67 = arith.constant 0 : index
    %97 = vector.load %arg10[%c0_66, %c0_67] : memref<64x72xf32, #tpu.memory_space<vmem>>, vector<64x8xf32>
    tpu.vector_store %arg10[%c0_66, %c0_67], %96 {strides = array<i32>} : memref<64x72xf32, #tpu.memory_space<vmem>>, vector<64x8xf32>,
    %c1_68 = arith.constant 1 : index
    %c0_69 = arith.constant 0 : index
    %98 = vector.load %arg8[%c1_68, %c0_69] : memref<82x8xf32, #tpu.memory_space<vmem>>, vector<64x8xf32>
    %c0_70 = arith.constant 0 : index
    %c8_71 = arith.constant 8 : index
    %99 = vector.load %arg10[%c0_70, %c8_71] : memref<64x72xf32, #tpu.memory_space<vmem>>, vector<64x8xf32>
    tpu.vector_store %arg10[%c0_70, %c8_71], %98 {strides = array<i32>} : memref<64x72xf32, #tpu.memory_space<vmem>>, vector<64x8xf32>,
    %c2_72 = arith.constant 2 : index
    %c0_73 = arith.constant 0 : index
    %100 = vector.load %arg8[%c2_72, %c0_73] : memref<82x8xf32, #tpu.memory_space<vmem>>, vector<64x8xf32>
    %cst_74 = arith.constant 0.000000e+00 : f32
    %101 = vector.shape_cast %39 : vector<64x1xi1> to vector<64x1xi1>
    %102 = vector.broadcast %101 : vector<64x1xi1> to vector<64x8xi1>
    %103 = vector.broadcast %cst_74 : f32 to vector<64x8xf32>
    %104 = arith.select %102, %100, %103 : vector<64x8xi1>, vector<64x8xf32>
    %c0_75 = arith.constant 0 : index
    %c16_76 = arith.constant 16 : index
    %105 = vector.load %arg10[%c0_75, %c16_76] : memref<64x72xf32, #tpu.memory_space<vmem>>, vector<64x8xf32>
    tpu.vector_store %arg10[%c0_75, %c16_76], %104 {strides = array<i32>} : memref<64x72xf32, #tpu.memory_space<vmem>>, vector<64x8xf32>,
    %c8_77 = arith.constant 8 : index
    %c0_78 = arith.constant 0 : index
    %106 = vector.load %arg8[%c8_77, %c0_78] : memref<82x8xf32, #tpu.memory_space<vmem>>, vector<64x8xf32>
    %cst_79 = arith.constant 0.000000e+00 : f32
    %107 = vector.shape_cast %37 : vector<64x1xi1> to vector<64x1xi1>
    %108 = vector.broadcast %107 : vector<64x1xi1> to vector<64x8xi1>
    %109 = vector.broadcast %cst_79 : f32 to vector<64x8xf32>
    %110 = arith.select %108, %106, %109 : vector<64x8xi1>, vector<64x8xf32>
    %c0_80 = arith.constant 0 : index
    %c24_81 = arith.constant 24 : index
    %111 = vector.load %arg10[%c0_80, %c24_81] : memref<64x72xf32, #tpu.memory_space<vmem>>, vector<64x8xf32>
    tpu.vector_store %arg10[%c0_80, %c24_81], %110 {strides = array<i32>} : memref<64x72xf32, #tpu.memory_space<vmem>>, vector<64x8xf32>,
    %c9_82 = arith.constant 9 : index
    %c0_83 = arith.constant 0 : index
    %112 = vector.load %arg8[%c9_82, %c0_83] : memref<82x8xf32, #tpu.memory_space<vmem>>, vector<64x8xf32>
    %c0_84 = arith.constant 0 : index
    %c32_85 = arith.constant 32 : index
    %113 = vector.load %arg10[%c0_84, %c32_85] : memref<64x72xf32, #tpu.memory_space<vmem>>, vector<64x8xf32>
    tpu.vector_store %arg10[%c0_84, %c32_85], %112 {strides = array<i32>} : memref<64x72xf32, #tpu.memory_space<vmem>>, vector<64x8xf32>,
    %c10_86 = arith.constant 10 : index
    %c0_87 = arith.constant 0 : index
    %114 = vector.load %arg8[%c10_86, %c0_87] : memref<82x8xf32, #tpu.memory_space<vmem>>, vector<64x8xf32>
    %cst_88 = arith.constant 0.000000e+00 : f32
    %115 = vector.shape_cast %39 : vector<64x1xi1> to vector<64x1xi1>
    %116 = vector.broadcast %115 : vector<64x1xi1> to vector<64x8xi1>
    %117 = vector.broadcast %cst_88 : f32 to vector<64x8xf32>
    %118 = arith.select %116, %114, %117 : vector<64x8xi1>, vector<64x8xf32>
    %c0_89 = arith.constant 0 : index
    %c40 = arith.constant 40 : index
    %119 = vector.load %arg10[%c0_89, %c40] : memref<64x72xf32, #tpu.memory_space<vmem>>, vector<64x8xf32>
    tpu.vector_store %arg10[%c0_89, %c40], %118 {strides = array<i32>} : memref<64x72xf32, #tpu.memory_space<vmem>>, vector<64x8xf32>,
    %c16_90 = arith.constant 16 : index
    %c0_91 = arith.constant 0 : index
    %120 = vector.load %arg8[%c16_90, %c0_91] : memref<82x8xf32, #tpu.memory_space<vmem>>, vector<64x8xf32>
    %cst_92 = arith.constant 0.000000e+00 : f32
    %121 = vector.shape_cast %37 : vector<64x1xi1> to vector<64x1xi1>
    %122 = vector.broadcast %121 : vector<64x1xi1> to vector<64x8xi1>
    %123 = vector.broadcast %cst_92 : f32 to vector<64x8xf32>
    %124 = arith.select %122, %120, %123 : vector<64x8xi1>, vector<64x8xf32>
    %c0_93 = arith.constant 0 : index
    %c48 = arith.constant 48 : index
    %125 = vector.load %arg10[%c0_93, %c48] : memref<64x72xf32, #tpu.memory_space<vmem>>, vector<64x8xf32>
    tpu.vector_store %arg10[%c0_93, %c48], %124 {strides = array<i32>} : memref<64x72xf32, #tpu.memory_space<vmem>>, vector<64x8xf32>,
    %c17_94 = arith.constant 17 : index
    %c0_95 = arith.constant 0 : index
    %126 = vector.load %arg8[%c17_94, %c0_95] : memref<82x8xf32, #tpu.memory_space<vmem>>, vector<64x8xf32>
    %c0_96 = arith.constant 0 : index
    %c56 = arith.constant 56 : index
    %127 = vector.load %arg10[%c0_96, %c56] : memref<64x72xf32, #tpu.memory_space<vmem>>, vector<64x8xf32>
    tpu.vector_store %arg10[%c0_96, %c56], %126 {strides = array<i32>} : memref<64x72xf32, #tpu.memory_space<vmem>>, vector<64x8xf32>,
    %c18_97 = arith.constant 18 : index
    %c0_98 = arith.constant 0 : index
    %128 = vector.load %arg8[%c18_97, %c0_98] : memref<82x8xf32, #tpu.memory_space<vmem>>, vector<64x8xf32>
    %cst_99 = arith.constant 0.000000e+00 : f32
    %129 = vector.shape_cast %39 : vector<64x1xi1> to vector<64x1xi1>
    %130 = vector.broadcast %129 : vector<64x1xi1> to vector<64x8xi1>
    %131 = vector.broadcast %cst_99 : f32 to vector<64x8xf32>
    %132 = arith.select %130, %128, %131 : vector<64x8xi1>, vector<64x8xf32>
    %c0_100 = arith.constant 0 : index
    %c64 = arith.constant 64 : index
    %133 = vector.load %arg10[%c0_100, %c64] : memref<64x72xf32, #tpu.memory_space<vmem>>, vector<64x8xf32>
    tpu.vector_store %arg10[%c0_100, %c64], %132 {strides = array<i32>} : memref<64x72xf32, #tpu.memory_space<vmem>>, vector<64x8xf32>,
    %c0_101 = arith.constant 0 : index
    %c0_102 = arith.constant 0 : index
    %134 = vector.load %arg10[%c0_101, %c0_102] : memref<64x72xf32, #tpu.memory_space<vmem>>, vector<64x72xf32>
    %135 = arith.truncf %134 : vector<64x72xf32> to vector<64x72xbf16>
    %c0_103 = arith.constant 0 : index
    %c0_104 = arith.constant 0 : index
    %136 = vector.load %arg4[%c0_103, %c0_104] : memref<72x8xbf16, #tpu.memory_space<vmem>>, vector<72x8xbf16>
    %cst_105 = arith.constant dense<0.000000e+00> : vector<64x8xf32>
    %137 = tpu.matmul %135, %136, %cst_105 {dimension_numbers = #tpu.dot_dimension_numbers<[1], [0], [0], [1], [0, 0, 1, 1], [], []>} : vector<64x72xbf16>, vector<72x8xbf16>, vector<64x8xf32> -> vector<64x8xf32>
    %c0_106 = arith.constant 0 : index
    %c0_107 = arith.constant 0 : index
    %138 = vector.load %arg5[%c0_106, %c0_107] : memref<1x8xf32, #tpu.memory_space<vmem>>, vector<1x8xf32>
    %139 = vector.broadcast %138 : vector<1x8xf32> to vector<64x8xf32>
    %140 = arith.addf %137, %139 : vector<64x8xf32>
    %cst_108 = arith.constant 0.000000e+00 : f32
    %141 = vector.broadcast %cst_108 : f32 to vector<64x8xf32>
    %142 = arith.maximumf %140, %141 : vector<64x8xf32>
    %143 = tpu.transpose %142, [1, 0] : vector<64x8xf32> -> vector<8x64xf32>
    %c0_109 = arith.constant 0 : index
    %c0_110 = arith.constant 0 : index
    %c0_111 = arith.constant 0 : index
    %144 = vector.load %arg6[%c0_109, %c0_110, %c0_111] : memref<1x8x64xf32, #tpu.memory_space<vmem>>, vector<1x8x64xf32>
    %145 = vector.shape_cast %144 : vector<1x8x64xf32> to vector<8x64xf32>
    %146 = vector.shape_cast %143 : vector<8x64xf32> to vector<1x8x64xf32>
    tpu.vector_store %arg6[%c0_109, %c0_110, %c0_111], %146 {strides = array<i32>} : memref<1x8x64xf32, #tpu.memory_space<vmem>>, vector<1x8x64xf32>,
    return
  }
  func.func @transform_0(%arg0: i32) -> (i32, i32, i32, i32, i32) {
    %c0_i32 = arith.constant 0 : i32
    %c0_i32_0 = arith.constant 0 : i32
    %c0_i32_1 = arith.constant 0 : i32
    %c0_i32_2 = arith.constant 0 : i32
    %c0_i32_3 = arith.constant 0 : i32
    return %arg0, %c0_i32, %c0_i32_0, %c0_i32_1, %c0_i32_2 : i32, i32, i32, i32, i32
  }
  func.func @transform_1(%arg0: i32) -> (i32, i32) {
    %c0_i32 = arith.constant 0 : i32
    %c0_i32_0 = arith.constant 0 : i32
    %c0_i32_1 = arith.constant 0 : i32
    return %c0_i32, %c0_i32_0 : i32, i32
  }
  func.func @transform_2(%arg0: i32) -> (i32, i32) {
    %c0_i32 = arith.constant 0 : i32
    %c0_i32_0 = arith.constant 0 : i32
    %c0_i32_1 = arith.constant 0 : i32
    return %c0_i32, %c0_i32_0 : i32, i32
  }
  func.func @transform_3(%arg0: i32) -> (i32, i32) {
    %c0_i32 = arith.constant 0 : i32
    %c0_i32_0 = arith.constant 0 : i32
    %c0_i32_1 = arith.constant 0 : i32
    return %c0_i32, %c0_i32_0 : i32, i32
  }
  func.func @transform_4(%arg0: i32) -> (i32, i32) {
    %c0_i32 = arith.constant 0 : i32
    %c0_i32_0 = arith.constant 0 : i32
    %c0_i32_1 = arith.constant 0 : i32
    return %c0_i32, %c0_i32_0 : i32, i32
  }
  func.func @transform_5(%arg0: i32) -> (i32, i32, i32) {
    %c0_i32 = arith.constant 0 : i32
    %c0_i32_0 = arith.constant 0 : i32
    %c0_i32_1 = arith.constant 0 : i32
    return %arg0, %c0_i32, %c0_i32_0 : i32, i32, i32
  }
}

</mosaic_0001>

<bundles_post_ra>
// kernel: down_forward.1
= control target key start
LH: loop header
LB: loop body
LE: loop exit
PB: predicated region body
PF: predicated region fallthrough
CT: control target
= control target key end

     0   :  { %s1874_s18 = smov 0   ;;  %s2682_s0 = inlined_call_operand.vmem [shape: bf16[2,8,2,8,8], index: 0, kind: input, shape index: {}]   ;;  %s2683_s1 = inlined_call_operand.vmem [shape: bf16[36,8], index: 1, kind: input, shape index: {}]   ;;  %s2684_s2 = inlined_call_operand.vmem [shape: f32[1,8], index: 2, kind: input, shape index: {}]   ;;  %s2685_s3 = inlined_call_operand.vmem [shape: bf16[72,8], index: 3, kind: input, shape index: {}]   ;;  %s2686_s4 = inlined_call_operand.vmem [shape: f32[1,8], index: 4, kind: input, shape index: {}]   ;;  %s2687_s5 = inlined_call_operand.vmem [shape: f32[2,8,64], index: 5, kind: output, shape index: {}]  }
   0x1 LB: > { %s1713_s19 = sadd.s32 4294967295, %s1828_s18   ;;  %p1717_p0 = scmp.ge.s32.totalorder %s1828_s18, 1  ;;  %s1828_s18 = sphi %s1874_s18, %s15_s18  }
   0x2   : > { %p187_p1 = scmp.lt.s32.totalorder %s1828_s18, 3 }
   0x4   : > { %p188_p2 = pnand %p1717_p0, %p187_p1 }
   0x5   : > { %p214_p3 = scmp.lt.s32.totalorder (!%p188_p2), %s1713_s19, 1  ;;  %s1830_s24 = smov (!%p188_p2), 124  }
   0x6   : > { %191 = sbr.rel (%p188_p2) target bundleno = 1087 (0x43f), region = 40  ;;  %s1832_s25 = smov (!%p188_p2), 4  }
   0x7   : > { %s1833_s26 = smov (!%p188_p2), 16   ;;  %s1834_s27 = smov (!%p188_p2), 28  }
   0x8   : > { %s1835_s28 = smov (!%p188_p2), 8   ;;  %s1836_s29 = smov (!%p188_p2), 20  }
   0x9   : > { %s1837_s30 = smov (!%p188_p2), 32   ;;  %s1838_s6 = smov (!%p188_p2), 12  }
   0xa   : > { %s1839_s7 = smov (!%p188_p2), 24   ;;  %s1840_s16 = smov (!%p188_p2), 56  }
   0xb   : > { %s2783_s19 = smov (!%p214_p3, %s1713_s19), 1  ;;  %vm329_vm0 = vcmask 31744   ;;  %vm331_vm1 = vcmask 24576   ;;  %v1831_v36 = vmov 0.0   ;;  %v357_v42 = vlaneseq  ;;  %s1841_s17 = smov 48  }
   0xc   : > { %s1763_s20 = sshll.u32 %s2783_s19, 6  ;;  %330 = vst.msk [vmem:[#allocation2] sm:$0xff] %vm329_vm0, %v1831_v36  ;;  %vm558_vm14 = vcmask 64544   ;;  %s1843_s21 = smov 64  }
   0xd   : > { %s218_s23 = scalar_lea.vmem %s2682_s0, %s1763_s20  ;;  %332 = vst.msk [vmem:[#allocation2 + $0x8] sm:$0x1] %vm331_vm1, %v1831_v36  ;;  %v1895_v51 = vshrl.u32 %v357_v42, 7  ;;  %s1842_s20 = smov 40  }
   0xe   : > { %v229_v0 = vld [vmem:[%s218_s23 + $0x28] sm:$0xff]   ;;  %v230_v1 = vld [vmem:[%s218_s23 + $0x30] sm:$0xff]   ;;  %v227_v8 = vld [vmem:[%s218_s23 + $0x18] sm:$0xff]   ;;  %333 = vst.msk [vmem:[#allocation2 + $0x49] sm:$0xff] %vm329_vm0, %v1831_v36  ;;  %s1720_s9 = sshll.u32 %s2783_s19, 3 }
   0xf   : > { %v225_v2 = vld [vmem:[%s218_s23 + $0x8] sm:$0xff]   ;;  %v246_v3 = vunpack.c.l.bf16 %v229_v0  ;;  %v247_v4 = vunpack.c.l.bf16 %v230_v1  ;;  %v254_v5 = vunpack.c.h.bf16 %v229_v0  ;;  %v255_v6 = vunpack.c.h.bf16 %v230_v1  ;;  %v226_v7 = vld [vmem:[%s218_s23 + $0x10] sm:$0xff]   ;;  %v228_v9 = vld [vmem:[%s218_s23 + $0x20] sm:$0xff]   ;;  %334 = vst.msk [vmem:[#allocation2 + $0x51] sm:$0x1] %vm331_vm1, %v1831_v36  ;;  %s222_s12 = scalar_lea.vmem %s2687_s5, %s1720_s9 }
  0x10   : > { %v242_v10 = vunpack.c.l.bf16 %v225_v2  ;;  %v243_v11 = vunpack.c.l.bf16 %v226_v7  ;;  %v250_v12 = vunpack.c.h.bf16 %v225_v2  ;;  %v251_v13 = vunpack.c.h.bf16 %v226_v7  ;;  %v224_v14 = vld [vmem:[%s218_s23] sm:$0xff]   ;;  %v231_v15 = vld [vmem:[%s218_s23 + $0x38] sm:$0xff]  }
  0x11   : > { %v262_v16 = vmax.f32 %v246_v3, %v254_v5  ;;  %v263_v17 = vmax.f32 %v247_v4, %v255_v6  ;;  %v244_v18 = vunpack.c.l.bf16 %v227_v8  ;;  %v245_v19 = vunpack.c.l.bf16 %v228_v9 }
  0x12   : > { %v258_v20 = vmax.f32 %v242_v10, %v250_v12  ;;  %v259_v21 = vmax.f32 %v243_v11, %v251_v13  ;;  %v252_v22 = vunpack.c.h.bf16 %v227_v8  ;;  %v253_v23 = vunpack.c.h.bf16 %v228_v9 }
  0x13   : > { %v241_v24 = vunpack.c.l.bf16 %v224_v14  ;;  %v248_v25 = vunpack.c.l.bf16 %v231_v15  ;;  %v249_v28 = vunpack.c.h.bf16 %v224_v14  ;;  %v256_v29 = vunpack.c.h.bf16 %v231_v15 }
  0x14   : > { %v260_v26 = vmax.f32 %v244_v18, %v252_v22  ;;  %v261_v27 = vmax.f32 %v245_v19, %v253_v23  ;;  %v1810_v30 = vpack.i.bf16 %v263_v17, %v262_v16  ;;  %v1800_v33 = vpack.i.bf16 %v259_v21, %v258_v20  ;;  %v518_v37 = vld [vmem:[#allocation2 + $0x1] sm:$0xff] }
  0x15   : > { %v257_v31 = vmax.f32 %v241_v24, %v249_v28  ;;  %v264_v32 = vmax.f32 %v248_v25, %v256_v29  ;;  %v1898_v59 = vadd.s32 56, %v1895_v51  ;;  %v1902_v63 = vadd.s32 24, %v1895_v51 }
  0x16   : > { %1811 = vrot.lane.b32.xlu1 %v1810_v30, %s1830_s24  ;;  %1801 = vrot.lane.b32.xlu0 %v1800_v33, %s1830_s24  ;;  %v1805_v35 = vpack.i.bf16 %v261_v27, %v260_v26  ;;  %v1910_v13 = vadd.s32 16, %v1895_v51  ;;  %v1945_v25 = vadd.s32 32, %v1895_v51  ;;  %v1955_v28 = vadd.s32 8, %v1895_v51 }
  0x17   : > { %v1815_v34 = vpack.i.bf16 %v257_v31, %v264_v32  ;;  %v419_v6 = vand.u32 7, %v1898_v59  ;;  %v391_v9 = vand.u32 7, %v1902_v63  ;;  %v1958_v29 = vadd.s32 48, %v1895_v51 }
  0x18   : > { %v384_v24 = vand.u32 7, %v1910_v13 }
  0x19   : > { %vm1914_vm2 = vcmp.ge.s32.totalorder %v419_v6, 1  ;;  %vm1921_vm3 = vcmp.ge.s32.totalorder %v391_v9, 1  ;;  %vm2041_vm9 = vcmp.le.s32.totalorder %v391_v9, 6 }
  0x1a   : > { %vm1961_vm4 = vcmp.ge.s32.totalorder %v384_v24, 1  ;;  %vm2059_vm10 = vcmp.le.s32.totalorder %v384_v24, 6 }
  0x1e   : > { %1816 = vrot.lane.b32.xlu1 %v1815_v34, %s1830_s24  ;;  %1806 = vrot.lane.b32.xlu0 %v1805_v35, %s1830_s24 }
  0x26   : > { %534 = vrot.lane.b32.xlu0 %v518_v37, %s1832_s25 }
  0x88   : > { %v1812_v38 = vpop.permute.xlu1 %1811  ;;  %v1802_v41 = vpop.permute.xlu0 %1801 }
  0x89   : > { %v1814_v39 = vunpack.i.h.bf16 %v1812_v38  ;;  %v1813_v40 = vunpack.i.l.bf16 %v1812_v38  ;;  %v1804_v43 = vunpack.i.h.bf16 %v1802_v41  ;;  %v1803_v44 = vunpack.i.l.bf16 %v1802_v41  ;;  %v1540_v41 = vld [vmem:[%s2685_s3 + $0x20] sm:$0xf] }
  0x8a   : > { %v377_v38 = vand.u32 7, %v1955_v28 }
  0x8b   : > { %v319_v45 = vmax.f32 %v263_v17, %v1814_v39  ;;  %v318_v46 = vmax.f32 %v262_v16, %v1813_v40  ;;  %v315_v47 = vmax.f32 %v259_v21, %v1804_v43  ;;  %v314_v48 = vmax.f32 %v258_v20, %v1803_v44 }
  0x8c   : > { %v2711_v17 = vmov 0  ;;  %v412_v39 = vand.u32 7, %v1958_v29  ;;  %vm1999_vm7 = vcmp.ge.s32.totalorder %v377_v38, 1 }
  0x8d   : > { %v327_v49 = vpack.c.bf16 %v319_v45, %v319_v45  ;;  %v326_v50 = vpack.c.bf16 %v318_v46, %v318_v46  ;;  %v323_v52 = vpack.c.bf16 %v315_v47, %v315_v47  ;;  %v322_v53 = vpack.c.bf16 %v314_v48, %v314_v48 }
  0x8e   : > { %v2712_v17 = vsel %vm1914_vm2, 4294967295, %v2711_v17  ;;  %vm2005_vm8 = vcmp.ge.s32.totalorder %v412_v39, 1  ;;  %vm2191_vm1 = vcmp.le.s32.totalorder %v412_v39, 6 }
  0x8f   : > { %v347_v54 = vunpack.c.l.bf16 %v327_v49  ;;  %v346_v55 = vunpack.c.l.bf16 %v326_v50  ;;  %v343_v56 = vunpack.c.l.bf16 %v323_v52  ;;  %v342_v57 = vunpack.c.l.bf16 %v322_v53 }
  0x90   : > { %v1817_v58 = vpop.permute.xlu1 %1816  ;;  %v1807_v60 = vpop.permute.xlu0 %1806 }
  0x91   : > { %355 = vst.msk [vmem:[#allocation2 + $0x39] sm:$0xff] %vm329_vm0, %v347_v54  ;;  %v1819_v61 = vunpack.i.h.bf16 %v1817_v58  ;;  %v1818_v62 = vunpack.i.l.bf16 %v1817_v58  ;;  %v1809_v0 = vunpack.i.h.bf16 %v1807_v60  ;;  %v1808_v1 = vunpack.i.l.bf16 %v1807_v60 }
  0x92   : > { %354 = vst.msk [vmem:[#allocation2 + $0x31] sm:$0xff] %vm329_vm0, %v346_v55 }
  0x93   : > { %351 = vst.msk [vmem:[#allocation2 + $0x19] sm:$0xff] %vm329_vm0, %v343_v56  ;;  %v313_v2 = vmax.f32 %v257_v31, %v1819_v61  ;;  %v320_v3 = vmax.f32 %v264_v32, %v1818_v62  ;;  %v317_v4 = vmax.f32 %v261_v27, %v1809_v0  ;;  %v316_v5 = vmax.f32 %v260_v26, %v1808_v1 }
  0x94   : > { %350 = vst.msk [vmem:[#allocation2 + $0x11] sm:$0xff] %vm329_vm0, %v342_v57  ;;  %v1948_v26 = vadd.s32 40, %v1895_v51  ;;  %v398_v31 = vand.u32 7, %v1945_v25  ;;  %v2725_v56 = vmov 0  ;;  %v2727_v62 = vmov 0 }
  0x95   : > { %v321_v7 = vpack.c.bf16 %v313_v2, %v313_v2  ;;  %v328_v8 = vpack.c.bf16 %v320_v3, %v320_v3  ;;  %v325_v10 = vpack.c.bf16 %v317_v4, %v317_v4  ;;  %v324_v11 = vpack.c.bf16 %v316_v5, %v316_v5 }
  0x96   : > { %v405_v32 = vand.u32 7, %v1948_v26  ;;  %vm1989_vm6 = vcmp.ge.s32.totalorder %v398_v31, 1  ;;  %v2726_v56 = vsel %vm2041_vm9, 4294967295, %v2725_v56  ;;  %v2728_v62 = vsel %vm2059_vm10, 4294967295, %v2727_v62 }
  0x97   : > { %v341_v12 = vunpack.c.l.bf16 %v321_v7  ;;  %v345_v14 = vunpack.c.l.bf16 %v325_v10  ;;  %v344_v15 = vunpack.c.l.bf16 %v324_v11  ;;  %v348_v16 = vunpack.c.l.bf16 %v328_v8 }
  0x98   : > { %vm1982_vm5 = vcmp.ge.s32.totalorder %v405_v32, 1  ;;  %v2028_v55 = vld [vmem:[#allocation2 + $0x39] sm:$0xff]  ;;  %vm2074_vm11 = vcmp.le.s32.totalorder %v398_v31, 6  ;;  %v2729_v3 = vmov 0  ;;  %vm2103_vm12 = vcmp.le.s32.totalorder %v405_v32, 6 }
  0x99   : > { %349 = vst.msk [vmem:[#allocation2 + $0x9] sm:$0xff] %vm329_vm0, %v341_v12  ;;  %v1925_v19 = vld [vmem:[#allocation2 + $0x38] sm:$0xff]  ;;  %v2730_v3 = vsel %vm2074_vm11, 4294967295, %v2729_v3  ;;  %v2731_v11 = vmov 0 }
  0x9a   : > { %353 = vst.msk [vmem:[#allocation2 + $0x29] sm:$0xff] %vm329_vm0, %v345_v14  ;;  %v1928_v20 = vld [vmem:[#allocation2 + $0x19] sm:$0xff]  ;;  %v509_v23 = vsel %vm1914_vm2, %v1925_v19, 0.0  ;;  %v702_v53 = vld [vmem:[#allocation2 + $0x31] sm:$0xff]  ;;  %v2732_v11 = vsel %vm2103_vm12, 4294967295, %v2731_v11  ;;  %v370_v14 = vand.u32 7, %v1895_v51 }
  0x9b   : > { %352 = vst.msk [vmem:[#allocation2 + $0x21] sm:$0xff] %vm329_vm0, %v344_v15  ;;  %v1931_v21 = vld [vmem:[#allocation2 + $0x11] sm:$0xff]  ;;  %717 = vrot.lane.b32.xlu1 %v1928_v20, %s1833_s26  ;;  %v816_v25 = vsel %vm1982_vm5, %v1925_v19, 0.0 }
  0x9c   : > { %v1935_v22 = vld [vmem:[#allocation2 + $0x18] sm:$0xff]  ;;  %356 = vst.msk [vmem:[#allocation2 + $0x41] sm:$0xff] %vm329_vm0, %v348_v16  ;;  %538 = vrot.lane.b32.xlu2 %v1931_v21, %s1832_s25  ;;  %vm2118_vm13 = vcmp.ge.s32.totalorder %v370_v14, 1  ;;  %vm2158_vm15 = vcmp.le.s32.totalorder %v370_v14, 6 }
  0x9d   : > { %v505_v27 = vsel %vm1921_vm3, %v1935_v22, 0.0  ;;  %517 = vst.msk [vmem:[#allocation4 + $0x38] sm:$0xff] %vm329_vm0, %v509_v23  ;;  %v2063_v63 = vld [vmem:[#allocation2 + $0x12] sm:$0xff]  ;;  %v650_v7 = vsel %vm1961_vm4, %v1935_v22, 0.0  ;;  %v535_v23 = vpop.permute.xlu0 %534 }
  0x9e   : > { %513 = vst.msk [vmem:[#allocation4 + $0x18] sm:$0xff] %vm329_vm0, %v505_v27  ;;  %v593_v1 = vsel %vm2059_vm10, %v2063_v63, 0.0  ;;  %v751_v51 = vld [vmem:[#allocation2 + $0x32] sm:$0xff] }
  0x9f   : > { %v759_v26 = vsel %vm2103_vm12, %v751_v51, 0.0 }
  0xa0   : > { %v1967_v33 = vld [vmem:[#allocation2 + $0x10] sm:$0xff]  ;;  %v1993_v44 = vld [vmem:[#allocation2 + $0x8] sm:$0xff] }
  0xa1   : > { %v523_v34 = vld [vmem:[#allocation2 + $0x29] sm:$0xff]  ;;  %v504_v35 = vsel %vm1961_vm4, %v1967_v33, 0.0  ;;  %v503_v50 = vsel %vm1999_vm7, %v1993_v44, 0.0 }
  0xa2   : > { %544 = vrot.lane.b32.xlu0 %v523_v34, %s1832_s25  ;;  %v862_v37 = vld [vmem:[#allocation2 + $0x21] sm:$0xff]  ;;  %512 = vst.msk [vmem:[#allocation4 + $0x10] sm:$0xff] %vm329_vm0, %v504_v35  ;;  %v1995_v45 = vld [vmem:[#allocation2 + $0x30] sm:$0xff] }
  0xa3   : > { %880 = vrot.lane.b32.xlu1 %v862_v37, %s1834_s27  ;;  %v1978_v40 = vld [vmem:[#allocation2 + $0x20] sm:$0xff]  ;;  %v1986_v42 = vld [vmem:[#allocation2 + $0x28] sm:$0xff]  ;;  %v508_v54 = vsel %vm2005_vm8, %v1995_v45, 0.0  ;;  %511 = vst.msk [vmem:[#allocation4 + $0x8] sm:$0xff] %vm329_vm0, %v503_v50  ;;  %v653_v9 = vsel %vm1982_vm5, %v1995_v45, 0.0 }
  0xa4   : > { %540 = vrot.lane.b32.xlu2 %v1928_v20, %s1832_s25  ;;  %v507_v48 = vsel %vm1982_vm5, %v1986_v42, 0.0  ;;  %v506_v49 = vsel %vm1989_vm6, %v1978_v40, 0.0  ;;  %v519_v52 = vld [vmem:[#allocation2 + $0x9] sm:$0xff]  ;;  %516 = vst.msk [vmem:[#allocation4 + $0x30] sm:$0xff] %vm329_vm0, %v508_v54  ;;  %v2045_v57 = vld [vmem:[#allocation2 + $0x1a] sm:$0xff]  ;;  %v651_v4 = vsel %vm1921_vm3, %v1978_v40, 0.0 }
  0xa5   : > { %515 = vst.msk [vmem:[#allocation4 + $0x28] sm:$0xff] %vm329_vm0, %v507_v48  ;;  %v594_v58 = vsel %vm2041_vm9, %v2045_v57, 0.0  ;;  %v749_v60 = vld [vmem:[#allocation2 + $0x22] sm:$0xff]  ;;  %v912_v0 = vld [vmem:[#allocation2 + $0x2a] sm:$0xff]  ;;  %v756_v8 = vsel %vm2059_vm10, %v2045_v57, 0.0  ;;  %v813_v10 = vsel %vm1961_vm4, %v1978_v40, 0.0 }
  0xa6   : > { %514 = vst.msk [vmem:[#allocation4 + $0x20] sm:$0xff] %vm329_vm0, %v506_v49  ;;  %v757_v61 = vsel %vm2041_vm9, %v749_v60, 0.0  ;;  %v920_v2 = vsel %vm2041_vm9, %v912_v0, 0.0  ;;  %v595_v5 = vsel %vm2074_vm11, %v749_v60, 0.0  ;;  %v814_v12 = vsel %vm1921_vm3, %v1986_v42, 0.0  ;;  %v2137_v31 = vld [vmem:[#allocation2 + $0x3a] sm:$0xff] }
  0xa7   : > { %v758_v13 = vsel %vm2074_vm11, %v912_v0, 0.0  ;;  %v596_v15 = vsel %vm2103_vm12, %v912_v0, 0.0  ;;  %v919_v24 = vsel %vm2059_vm10, %v749_v60, 0.0  ;;  %v652_v32 = vsel %vm1989_vm6, %v1986_v42, 0.0  ;;  %v567_v40 = vld [vmem:[#allocation2 + $0x2] sm:$0xff] }
  0xa8   : > { %v922_v35 = vsel %vm2103_vm12, %v2137_v31, 0.0  ;;  %v815_v42 = vsel %vm1989_vm6, %v1995_v45, 0.0  ;;  %v648_v48 = vsel %vm2118_vm13, %v1993_v44, 0.0  ;;  %v591_v50 = vsel %vm2158_vm15, %v567_v40, 0.0  ;;  %v568_v45 = vld [vmem:[#allocation2 + $0xa] sm:$0xff] }
  0xa9   : > { %v811_v54 = vsel %vm2118_vm13, %v1967_v33, 0.0  ;;  %v2739_v60 = vmov 0  ;;  %v754_v0 = vsel %vm2158_vm15, %v568_v45, 0.0  ;;  %vm2228_vm12 = vcmp.le.s32.totalorder %v419_v6, 6 }
  0xaa   : > { %723 = vrot.lane.b32.xlu0 %v702_v53, %s1833_s26  ;;  %v2740_v60 = vsel %vm2191_vm1, 4294967295, %v2739_v60  ;;  %v760_v14 = vsel %vm2191_vm1, %v2137_v31, 0.0  ;;  %vm2748_vm10 = vcmask 195744  }
  0xab   : > { %536 = vrot.lane.b32.xlu1 %v519_v52, %s1832_s25 }
  0xac   : > { %719 = vrot.lane.b32.xlu2 %v862_v37, %s1833_s26 }
  0xb2   : > { %886 = vrot.lane.b32.xlu0 %v2028_v55, %s1834_s27 }
  0xb3   : > { %715 = vrot.lane.b32.xlu1 %v1931_v21, %s1833_s26 }
  0xb4   : > { %882 = vrot.lane.b32.xlu2 %v523_v34, %s1834_s27 }
  0xba   : > { %713 = vrot.lane.b32.xlu0 %v519_v52, %s1833_s26 }
  0xbb   : > { %548 = vrot.lane.b32.xlu1 %v2028_v55, %s1832_s25 }
  0xbc   : > { %542 = vrot.lane.b32.xlu2 %v862_v37, %s1832_s25 }
  0xc2   : > { %546 = vrot.lane.b32.xlu0 %v702_v53, %s1832_s25 }
  0xc3   : > { %613 = vrot.lane.b32.xlu1 %v594_v58, %s1835_s28  ;;  %v649_v58 = vsel %vm1999_vm7, %v1967_v33, 0.0  ;;  %v597_v33 = vsel %vm2191_vm1, %v751_v51, 0.0 }
  0xc4   : > { %721 = vrot.lane.b32.xlu2 %v523_v34, %s1833_s26  ;;  %v921_v34 = vsel %vm2074_vm11, %v751_v51, 0.0  ;;  %v810_v51 = vld [vmem:[#allocation2 + $0x48] sm:$0xff]  ;;  %vm2692_vm11 = vcmask 97344  }
  0xca   : > { %878 = vrot.lane.b32.xlu0 %v1928_v20, %s1834_s27  ;;  %v478_v20 = vld [vmem:[#allocation2] sm:$0xff] }
  0xcb   : > { %776 = vrot.lane.b32.xlu1 %v757_v61, %s1836_s29 }
  0xcc   : > { %884 = vrot.lane.b32.xlu2 %v702_v53, %s1834_s27  ;;  %v2737_v53 = vmov 0 }
  0xd2   : > { %611 = vrot.lane.b32.xlu0 %v593_v1, %s1835_s28 }
  0xd3   : > { %939 = vrot.lane.b32.xlu1 %v920_v2, %s1837_s30  ;;  %v917_v2 = vsel %vm2158_vm15, %v2063_v63, 0.0 }
  0xd4   : > { %876 = vrot.lane.b32.xlu2 %v1931_v21, %s1834_s27  ;;  %v502_v21 = vsel %vm2118_vm13, %v478_v20, 0.0 }
  0xd5   : > { %510 = vst.msk [vmem:[#allocation4] sm:$0xff] %vm329_vm0, %v502_v21  ;;  %vm2170_vm0 = vcmp.le.s32.totalorder %v377_v38, 6 }
  0xd6   : > { %559 = vst.msk [vmem:[#allocation4] sm:$0xff] %vm558_vm14, %v535_v23  ;;  %v2738_v53 = vsel %vm2170_vm0, 4294967295, %v2737_v53  ;;  %v592_v44 = vsel %vm2170_vm0, %v568_v45, 0.0  ;;  %v755_v61 = vsel %vm2170_vm0, %v2063_v63, 0.0  ;;  %v647_v63 = vld [vmem:[#allocation2 + $0x40] sm:$0xff] }
  0xda   : > { %670 = vrot.lane.b32.xlu0 %v651_v4, %s1838_s6  ;;  %v918_v4 = vsel %vm2170_vm0, %v2045_v57, 0.0  ;;  %v2741_v57 = vmov 0 }
  0xdb   : > { %615 = vrot.lane.b32.xlu1 %v595_v5, %s1835_s28  ;;  %v812_v5 = vsel %vm1999_vm7, %v1935_v22, 0.0  ;;  %v2742_v57 = vsel %vm2228_vm12, 4294967295, %v2741_v57  ;;  %v598_v22 = vsel %vm2228_vm12, %v2137_v31, 0.0 }
  0xdc   : > { %668 = vrot.lane.b32.xlu2 %v650_v7, %s1838_s6 }
  0xe2   : > { %774 = vrot.lane.b32.xlu0 %v756_v8, %s1836_s29 }
  0xe3   : > { %674 = vrot.lane.b32.xlu1 %v653_v9, %s1838_s6 }
  0xe4   : > { %831 = vrot.lane.b32.xlu2 %v813_v10, %s1839_s7  ;;  %v655_v10 = vsel %vm1914_vm2, %v647_v63, 0.0 }
  0xea   : > { %833 = vrot.lane.b32.xlu0 %v814_v12, %s1839_s7 }
  0xeb   : > { %778 = vrot.lane.b32.xlu1 %v758_v13, %s1836_s29  ;;  %v753_v13 = vld [vmem:[#allocation2 + $0x42] sm:$0xff] }
  0xec   : > { %617 = vrot.lane.b32.xlu2 %v596_v15, %s1835_s28  ;;  %v654_v15 = vsel %vm2005_vm8, %v1925_v19, 0.0 }
  0xf2   : > { %937 = vrot.lane.b32.xlu0 %v919_v24, %s1837_s30  ;;  %v818_v24 = vsel %vm1914_vm2, %v810_v51, 0.0  ;;  %vm2709_vm2 = vcmask 261344  }
  0xf3   : > { %837 = vrot.lane.b32.xlu1 %v816_v25, %s1839_s7  ;;  %v866_v25 = vld [vmem:[#allocation2 + $0x41] sm:$0xff] }
  0xf4   : > { %780 = vrot.lane.b32.xlu2 %v759_v26, %s1836_s29 }
  0xf6   : > { %v539_v27 = vpop.permute.xlu2 %538 }
  0xf7   : > { %561 = vst.msk [vmem:[#allocation4 + $0x10] sm:$0xff] %vm558_vm14, %v539_v27  ;;  %v916_v27 = vld [vmem:[#allocation2 + $0x4a] sm:$0xff] }
  0xfa   : > { %672 = vrot.lane.b32.xlu0 %v652_v32, %s1838_s6  ;;  %v924_v32 = vsel %vm2228_vm12, %v916_v27, 0.0 }
  0xfb   : > { %941 = vrot.lane.b32.xlu1 %v921_v34, %s1837_s30  ;;  %v923_v34 = vsel %vm2191_vm1, %v753_v13, 0.0  ;;  %vm2703_vm1 = vcmask 162944  }
  0xfc   : > { %943 = vrot.lane.b32.xlu2 %v922_v35, %s1837_s30  ;;  %v817_v35 = vsel %vm2005_vm8, %v647_v63, 0.0 }
  0xfe   : > { %v541_v37 = vpop.permute.xlu2 %540 }
  0xff   : > { %562 = vst.msk [vmem:[#allocation4 + $0x18] sm:$0xff] %vm558_vm14, %v541_v37 }
 0x102   : > { %835 = vrot.lane.b32.xlu0 %v815_v42, %s1839_s7 }
 0x103   : > { %664 = vrot.lane.b32.xlu1 %v648_v48, %s1838_s6  ;;  %v982_v48 = vld [vmem:[%s2683_s1 + $0x10] sm:$0x3] }
 0x104   : > { %607 = vrot.lane.b32.xlu2 %v591_v50, %s1835_s28  ;;  %v867_v50 = vld [vmem:[#allocation2 + $0x49] sm:$0xff]  ;;  %v996_v45 = vunpack.c.l.b16 %v982_v48 }
 0x106   : > { %v2166_v52 = vpop.permute.xlu2 %719 }
 0x10a   : > { %609 = vrot.lane.b32.xlu0 %v592_v44, %s1835_s28  ;;  %v999_v44 = vpack.c.b16 %v996_v45, %v996_v45 }
 0x10b   : > { %827 = vrot.lane.b32.xlu1 %v811_v54, %s1839_s7 }
 0x10c   : > { %666 = vrot.lane.b32.xlu2 %v649_v58, %s1838_s6 }
 0x10d   : > { %v2185_v28 = vpop.permute.xlu1 %717 }
 0x10e   : > { %v2187_v38 = vpop.permute.xlu2 %882 }
 0x112   : > { %772 = vrot.lane.b32.xlu0 %v755_v61, %s1836_s29 }
 0x113   : > { %619 = vrot.lane.b32.xlu1 %v597_v33, %s1835_s28 }
 0x114   : > { %770 = vrot.lane.b32.xlu2 %v754_v0, %s1836_s29  ;;  %v545_v29 = vpop.permute.xlu0 %544  ;;  %v1765_v0 = vld [vmem:[%s2683_s1 + $0x8] sm:$0xff] }
 0x115   : > { %564 = vst.msk [vmem:[#allocation4 + $0x28] sm:$0xff] %vm558_vm14, %v545_v29  ;;  %v2206_v39 = vpop.permute.xlu1 %880  ;;  %v1764_v29 = vld [vmem:[%s2683_s1] sm:$0xff] }
 0x116   : > { %v543_v1 = vpop.permute.xlu2 %542 }
 0x117   : > { %563 = vst.msk [vmem:[#allocation4 + $0x20] sm:$0xff] %vm558_vm14, %v543_v1 }
 0x11a   : > { %933 = vrot.lane.b32.xlu0 %v917_v2, %s1837_s30 }
 0x11b   : > { %935 = vrot.lane.b32.xlu1 %v918_v4, %s1837_s30 }
 0x11c   : > { %829 = vrot.lane.b32.xlu2 %v812_v5, %s1839_s7  ;;  %v2221_v7 = vpop.permute.xlu0 %723 }
 0x11d   : > { %v537_v8 = vpop.permute.xlu1 %536 }
 0x11e   : > { %v2223_v9 = vpop.permute.xlu2 %721  ;;  %560 = vst.msk [vmem:[#allocation4 + $0x8] sm:$0xff] %vm558_vm14, %v537_v8 }
 0x122   : > { %678 = vrot.lane.b32.xlu0 %v655_v10, %s1838_s6 }
 0x123   : > { %725 = vrot.lane.b32.xlu1 %v2028_v55, %s1833_s26  ;;  %v761_v55 = vsel %vm2228_vm12, %v753_v13, 0.0  ;;  %vm2743_vm12 = vcmask 97344  }
 0x124   : > { %621 = vrot.lane.b32.xlu2 %v598_v22, %s1835_s28  ;;  %v2241_v12 = vpop.permute.xlu0 %886  ;;  %vm2744_vm9 = vmmov %vm2743_vm12 }
 0x125   : > { %v2243_v59 = vpop.permute.xlu1 %715 }
 0x126   : > { %v2245_v6 = vpop.permute.xlu2 %884 }
 0x12a   : > { %782 = vrot.lane.b32.xlu0 %v760_v14, %s1836_s29 }
 0x12b   : > { %784 = vrot.lane.b32.xlu1 %v761_v55, %s1836_s29 }
 0x12c   : > { %676 = vrot.lane.b32.xlu2 %v654_v15, %s1838_s6  ;;  %v2258_v20 = vpop.permute.xlu0 %713 }
 0x12d   : > { %v549_v21 = vpop.permute.xlu1 %548 }
 0x12e   : > { %v2260_v23 = vpop.permute.xlu2 %876  ;;  %566 = vst.msk [vmem:[#allocation4 + $0x38] sm:$0xff] %vm558_vm14, %v549_v21 }
 0x132   : > { %841 = vrot.lane.b32.xlu0 %v818_v24, %s1839_s7 }
 0x133   : > { %888 = vrot.lane.b32.xlu1 %v866_v25, %s1834_s27 }
 0x134   : > { %727 = vrot.lane.b32.xlu2 %v866_v25, %s1833_s26  ;;  %v547_v19 = vpop.permute.xlu0 %546 }
 0x135   : > { %565 = vst.msk [vmem:[#allocation4 + $0x30] sm:$0xff] %vm558_vm14, %v547_v19  ;;  %v614_v26 = vpop.permute.xlu1 %613  ;;  %vm1015_vm14 = vcmask 1041408  }
 0x136   : > { %v669_v31 = vpop.permute.xlu2 %668  ;;  %635 = vst.msk [vmem:[#allocation4 + $0x18] sm:$0xff] %vm2692_vm11, %v614_v26  ;;  %vm2701_vm11 = vcmask 130144   ;;  %v1017_v61 = vsel %vm1015_vm14, %v999_v44, 0  ;;  %vm851_vm14 = vcmask 228544  }
 0x137   : > { %1770 = vmatpush.bf16.msra.mxu3 %v1017_v61  ;;  %1024 = vmatpush.bf16.msra.mxu0 %v1017_v61 }
 0x13a   : > { %945 = vrot.lane.b32.xlu0 %v923_v34, %s1837_s30 }
 0x13b   : > { %947 = vrot.lane.b32.xlu1 %v924_v32, %s1837_s30  ;;  %1771 = vmatpush.bf16.msra.mxu3 %v1765_v0 }
 0x13c   : > { %839 = vrot.lane.b32.xlu2 %v817_v35, %s1839_s7  ;;  %v2279_v37 = vpop.permute.xlu0 %878  ;;  %1025 = vmatpush.bf16.msra.mxu0 %v1765_v0 }
 0x13d   : > { %v777_v40 = vpop.permute.xlu1 %776 }
 0x13e   : > { %v832_v42 = vpop.permute.xlu2 %831 }
 0x13f   : > { %1772 = vmatpush.bf16.msra.mxu3 %v1764_v29 }
 0x140   : > { %1026 = vmatpush.bf16.msra.mxu0 %v1764_v29 }
 0x144   : > { %v612_v54 = vpop.permute.xlu0 %611  ;;  %890 = vrot.lane.b32.xlu2 %v867_v50, %s1834_s27 }
 0x145   : > { %634 = vst.msk [vmem:[#allocation4 + $0x10] sm:$0xff] %vm2743_vm12, %v612_v54  ;;  %v940_v58 = vpop.permute.xlu1 %939  ;;  %vm2702_vm12 = vcmask 195744  }
 0x146   : > { %v618_v33 = vpop.permute.xlu2 %617  ;;  %691 = vst.msk [vmem:[#allocation4 + $0x10] sm:$0xff] %vm2701_vm11, %v669_v31 }
 0x147   : > { %637 = vst.msk [vmem:[#allocation4 + $0x28] sm:$0xff] %vm2744_vm9, %v618_v33 }
 0x148   : > { %740 = vst.msk [vmem:[#allocation4 + $0x10] sm:$0xff] %vm2703_vm1, %v2185_v28 }
 0x14c   : > { %v671_v1 = vpop.permute.xlu0 %670 }
 0x14d   : > { %692 = vst.msk [vmem:[#allocation4 + $0x18] sm:$0xff] %vm2701_vm11, %v671_v1  ;;  %v616_v2 = vpop.permute.xlu1 %615 }
 0x14e   : > { %v781_v4 = vpop.permute.xlu2 %780  ;;  %741 = vst.msk [vmem:[#allocation4 + $0x18] sm:$0xff] %vm2703_vm1, %v2166_v52 }
 0x14f   : > { %636 = vst.msk [vmem:[#allocation4 + $0x20] sm:$0xff] %vm2744_vm9, %v616_v2  ;;  %vm2710_vm9 = vcmask 294144  }
 0x150   : > { %798 = vst.msk [vmem:[#allocation4 + $0x18] sm:$0xff] %vm2702_vm12, %v777_v40 }
 0x154   : > { %v775_v28 = vpop.permute.xlu0 %774 }
 0x155   : > { %797 = vst.msk [vmem:[#allocation4 + $0x10] sm:$0xff] %vm2702_vm12, %v775_v28  ;;  %v675_v5 = vpop.permute.xlu1 %674 }
 0x156   : > { %854 = vst.msk [vmem:[#allocation4 + $0x10] sm:$0xff] %vm851_vm14, %v832_v42  ;;  %v944_v8 = vpop.permute.xlu2 %943 }
 0x157   : > { %694 = vst.msk [vmem:[#allocation4 + $0x28] sm:$0xff] %vm2701_vm11, %v675_v5  ;;  %vm2745_vm11 = vcmask 97344  }
 0x158   : > { %743 = vst.msk [vmem:[#allocation4 + $0x28] sm:$0xff] %vm2703_vm1, %v2221_v7  ;;  %vm2746_vm1 = vcmask 130144  }
 0x159   : > { %800 = vst.msk [vmem:[#allocation4 + $0x28] sm:$0xff] %vm2702_vm12, %v781_v4  ;;  %vm2708_vm12 = vcmask 293888   ;;  %v2369_v4 = vld [vmem:[%s2684_s2] ss:$0 sm:$0xff] }
 0x15a   : > { %903 = vst.msk [vmem:[#allocation4 + $0x10] sm:$0xff] %vm2709_vm2, %v2206_v39 }
 0x15c   : > { %v834_v52 = vpop.permute.xlu0 %833 }
 0x15d   : > { %855 = vst.msk [vmem:[#allocation4 + $0x18] sm:$0xff] %vm851_vm14, %v834_v52  ;;  %v779_v63 = vpop.permute.xlu1 %778 }
 0x15e   : > { %904 = vst.msk [vmem:[#allocation4 + $0x18] sm:$0xff] %vm2709_vm2, %v2187_v38  ;;  %v608_v10 = vpop.permute.xlu2 %607 }
 0x15f   : > { %961 = vst.msk [vmem:[#allocation4 + $0x18] sm:$0xff] %vm2710_vm9, %v940_v58 }
 0x160   : > { %632 = vst.msk [vmem:[#allocation4] sm:$0xff] %vm2745_vm11, %v608_v10  ;;  %vm2747_vm11 = vcmask 162944  }
 0x161   : > { %vm2749_vm0 = vmmov %vm2747_vm11 }
 0x164   : > { %v938_v22 = vpop.permute.xlu0 %937 }
 0x165   : > { %960 = vst.msk [vmem:[#allocation4 + $0x10] sm:$0xff] %vm2710_vm9, %v938_v22  ;;  %v838_v7 = vpop.permute.xlu1 %837 }
 0x166   : > { %857 = vst.msk [vmem:[#allocation4 + $0x28] sm:$0xff] %vm851_vm14, %v838_v7  ;;  %v667_v39 = vpop.permute.xlu2 %666  ;;  %v969_v38 = vld [vmem:[#allocation4 + $0x18] sm:$0xff] }
 0x167   : > { %906 = vst.msk [vmem:[#allocation4 + $0x28] sm:$0xff] %vm2709_vm2, %v2241_v12 }
 0x168   : > { %963 = vst.msk [vmem:[#allocation4 + $0x28] sm:$0xff] %vm2710_vm9, %v944_v8 }
 0x16c   : > { %v673_v13 = vpop.permute.xlu0 %672  ;;  %v968_v14 = vld [vmem:[#allocation4 + $0x10] sm:$0xff] }
 0x16d   : > { %693 = vst.msk [vmem:[#allocation4 + $0x20] sm:$0xff] %vm2746_vm1, %v673_v13  ;;  %v942_v55 = vpop.permute.xlu1 %941  ;;  %v975_v15 = vpack.c.bf16 %v969_v38, %v968_v14 }
 0x16e   : > { %742 = vst.msk [vmem:[#allocation4 + $0x20] sm:$0xff] %vm2747_vm11, %v2223_v9  ;;  %v771_v21 = vpop.permute.xlu2 %770  ;;  %vm2750_vm11 = vmmov %vm2748_vm10 }
 0x16f   : > { %799 = vst.msk [vmem:[#allocation4 + $0x20] sm:$0xff] %vm2748_vm10, %v779_v63  ;;  %1738 = vmatmul.msk.bf16.vlgmr.msra.gmra.mxu3 %vm2708_vm12, %v975_v15  ;;  %vm2751_vm10 = vcmask 97344   ;;  %vm2752_vm12 = vmmov %vm2746_vm1  ;;  %v971_v27 = vld [vmem:[#allocation4 + $0x28] sm:$0xff] }
 0x174   : > { %v836_v51 = vpop.permute.xlu0 %835 }
 0x175   : > { %856 = vst.msk [vmem:[#allocation4 + $0x20] sm:$0xff] %vm851_vm14, %v836_v51  ;;  %v665_v12 = vpop.permute.xlu1 %664 }
 0x176   : > { %905 = vst.msk [vmem:[#allocation4 + $0x20] sm:$0xff] %vm2709_vm2, %v2245_v6  ;;  %v830_v24 = vpop.permute.xlu2 %829  ;;  %vm2753_vm2 = vmmov %vm2749_vm0 }
 0x177   : > { %962 = vst.msk [vmem:[#allocation4 + $0x20] sm:$0xff] %vm2710_vm9, %v942_v55  ;;  %vm2760_vm9 = vcmask 130144  }
 0x178   : > { %689 = vst.msk [vmem:[#allocation4] sm:$0xff] %vm2746_vm1, %v665_v12  ;;  %vm2754_vm1 = vcmask 261344  }
 0x179   : > { %738 = vst.msk [vmem:[#allocation4] sm:$0xff] %vm2749_vm0, %v2258_v20  ;;  %vm2755_vm0 = vcmask 293888  }
 0x17a   : > { %795 = vst.msk [vmem:[#allocation4] sm:$0xff] %vm2750_vm11, %v771_v21  ;;  %vm2756_vm11 = vmmov %vm2751_vm10 }
 0x17c   : > { %v610_v9 = vpop.permute.xlu0 %609 }
 0x17d   : > { %633 = vst.msk [vmem:[#allocation4 + $0x8] sm:$0xff] %vm2751_vm10, %v610_v9  ;;  %v828_v25 = vpop.permute.xlu1 %827  ;;  %vm2757_vm10 = vcmask 195744  }
 0x17e   : > { %690 = vst.msk [vmem:[#allocation4 + $0x8] sm:$0xff] %vm2752_vm12, %v667_v39  ;;  %v622_v19 = vpop.permute.xlu2 %621  ;;  %v970_v26 = vld [vmem:[#allocation4 + $0x20] sm:$0xff]  ;;  %vm2758_vm12 = vmmov %vm2754_vm1 }
 0x17f   : > { %739 = vst.msk [vmem:[#allocation4 + $0x8] sm:$0xff] %vm2753_vm2, %v2243_v59  ;;  %v976_v6 = vpack.c.bf16 %v971_v27, %v970_v26  ;;  %vm2759_vm2 = vmmov %vm2756_vm11 }
 0x180   : > { %852 = vst.msk [vmem:[#allocation4] sm:$0xff] %vm851_vm14, %v828_v25 }
 0x181   : > { %901 = vst.msk [vmem:[#allocation4] sm:$0xff] %vm2754_vm1, %v2260_v23  ;;  %1739 = vmatmul.msk.bf16.gmra.mxu3 %vm2755_vm0, %v976_v6  ;;  %vm2761_vm1 = vcmask 294144  }
 0x182   : > { %639 = vst.msk [vmem:[#allocation4 + $0x38] sm:$0xff] %vm2756_vm11, %v622_v19  ;;  %vm2762_vm0 = vmmov %vm2761_vm1 }
 0x183   : > { %vm2763_vm11 = vmmov %vm2760_vm9 }
 0x184   : > { %v773_v20 = vpop.permute.xlu0 %772 }
 0x185   : > { %796 = vst.msk [vmem:[#allocation4 + $0x8] sm:$0xff] %vm2757_vm10, %v773_v20  ;;  %v620_v31 = vpop.permute.xlu1 %619  ;;  %vm2764_vm10 = vcmask 162944  }
 0x186   : > { %853 = vst.msk [vmem:[#allocation4 + $0x8] sm:$0xff] %vm851_vm14, %v830_v24  ;;  %v677_v32 = vpop.permute.xlu2 %676 }
 0x187   : > { %902 = vst.msk [vmem:[#allocation4 + $0x8] sm:$0xff] %vm2758_vm12, %v2279_v37  ;;  %vm2765_vm12 = vmmov %vm2764_vm10 }
 0x188   : > { %638 = vst.msk [vmem:[#allocation4 + $0x30] sm:$0xff] %vm2759_vm2, %v620_v31  ;;  %vm2766_vm2 = vcmask 293888  }
 0x189   : > { %695 = vst.msk [vmem:[#allocation4 + $0x30] sm:$0xff] %vm2760_vm9, %v677_v32  ;;  %vm335_vm9 = vcmask 64512  }
 0x18a   : > { %336 = vst.msk [vmem:[#allocation3] sm:$0xff] %vm335_vm9, %v1831_v36 }
 0x18b   : > { %339 = vst.msk [vmem:[#allocation3 + $0x49] sm:$0xff] %vm335_vm9, %v1831_v36 }
 0x18c   : > { %v934_v59 = vpop.permute.xlu0 %933 }
 0x18d   : > { %958 = vst.msk [vmem:[#allocation4] sm:$0xff] %vm2761_vm1, %v934_v59  ;;  %v936_v23 = vpop.permute.xlu1 %935  ;;  %vm2767_vm1 = vcmask 195744  }
 0x18e   : > { %959 = vst.msk [vmem:[#allocation4 + $0x8] sm:$0xff] %vm2762_vm0, %v936_v23  ;;  %v728_v34 = vpop.permute.xlu2 %727  ;;  %vm2768_vm0 = vmmov %vm2767_vm1 }
 0x191   : > { %v1064_v49 = vld [vmem:[#allocation3] sm:$0xff] }
 0x194   : > { %v679_v35 = vpop.permute.xlu0 %678  ;;  %v966_v40 = vld [vmem:[#allocation4] sm:$0xff] }
 0x195   : > { %v726_v42 = vpop.permute.xlu1 %725  ;;  %696 = vst.msk [vmem:[#allocation4 + $0x38] sm:$0xff] %vm2763_vm11, %v679_v35  ;;  %v967_v48 = vld [vmem:[#allocation4 + $0x8] sm:$0xff]  ;;  %vm2769_vm11 = vcmask 261344  }
 0x196   : > { %744 = vst.msk [vmem:[#allocation4 + $0x30] sm:$0xff] %vm2764_vm10, %v726_v42  ;;  %v974_v37 = vpack.c.bf16 %v967_v48, %v966_v40  ;;  %v840_v50 = vpop.permute.xlu2 %839  ;;  %vm2770_vm10 = vmmov %vm2769_vm11 }
 0x197   : > { %745 = vst.msk [vmem:[#allocation4 + $0x38] sm:$0xff] %vm2765_vm12, %v728_v34  ;;  %vm2771_vm12 = vcmask 294144  }
 0x198   : > { %1737 = vmatmul.msk.bf16.vlgmr.msra.gmra.mxu0 %vm2766_vm2, %v974_v37  ;;  %vm2772_vm2 = vmmov %vm2771_vm12 }
 0x19c   : > { %v783_v45 = vpop.permute.xlu0 %782 }
 0x19d   : > { %v785_v44 = vpop.permute.xlu1 %784  ;;  %801 = vst.msk [vmem:[#allocation4 + $0x30] sm:$0xff] %vm2767_vm1, %v783_v45  ;;  %vm2773_vm1 = vcmask 293888  }
 0x19e   : > { %802 = vst.msk [vmem:[#allocation4 + $0x38] sm:$0xff] %vm2768_vm0, %v785_v44  ;;  %v891_v58 = vpop.permute.xlu2 %890  ;;  %vm2774_vm0 = vnez %v2738_v53 }
 0x19f   : > { %858 = vst.msk [vmem:[#allocation4 + $0x30] sm:$0xff] %vm851_vm14, %v840_v50 }
 0x1a4   : > { %v842_v54 = vpop.permute.xlu0 %841 }
 0x1a5   : > { %v889_v61 = vpop.permute.xlu1 %888  ;;  %859 = vst.msk [vmem:[#allocation4 + $0x38] sm:$0xff] %vm851_vm14, %v842_v54  ;;  %vm337_vm14 = vcmask 57344  }
 0x1a6   : > { %907 = vst.msk [vmem:[#allocation4 + $0x30] sm:$0xff] %vm2769_vm11, %v889_v61  ;;  %vm2775_vm11 = vnez %v2728_v62 }
 0x1a7   : > { %908 = vst.msk [vmem:[#allocation4 + $0x38] sm:$0xff] %vm2770_vm10, %v891_v58  ;;  %vm2776_vm10 = vnez %v2712_v17 }
 0x1a8   : > { %338 = vst.msk [vmem:[#allocation3 + $0x8] sm:$0x1] %vm337_vm14, %v1831_v36 }
 0x1a9   : > { %340 = vst.msk [vmem:[#allocation3 + $0x51] sm:$0x1] %vm337_vm14, %v1831_v36  ;;  %vm1454_vm14 = vcmask 523712  }
 0x1ac   : > { %v946_v33 = vpop.permute.xlu0 %945 }
 0x1ad   : > { %v948_v0 = vpop.permute.xlu1 %947  ;;  %964 = vst.msk [vmem:[#allocation4 + $0x30] sm:$0xff] %vm2771_vm12, %v946_v33  ;;  %vm2777_vm12 = vnez %v2726_v56 }
 0x1ae   : > { %965 = vst.msk [vmem:[#allocation4 + $0x38] sm:$0xff] %vm2772_vm2, %v948_v0  ;;  %vm2781_vm2 = vnez %v2742_v57 }
 0x1af   : > { %v1088_v22 = vld [vmem:[#allocation3 + $0x1] sm:$0xff] }
 0x1b0   : > { %1104 = vrot.lane.b32.xlu2 %v1088_v22, %s1835_s28 }
 0x1b4   : > { %v972_v29 = vld [vmem:[#allocation4 + $0x30] sm:$0xff] }
 0x1b5   : > { %v973_v1 = vld [vmem:[#allocation4 + $0x38] sm:$0xff] }
 0x1b6   : > { %v977_v2 = vpack.c.bf16 %v973_v1, %v972_v29 }
 0x1b8   : > { %1740 = vmatmul.msk.bf16.gmra.mxu3 %vm2773_vm1, %v977_v2  ;;  %vm1348_vm1 = vcmask 392512  }
 0x1f2   : > { %v1033_v28 = vpop.f32.mrf.mxu3 }
 0x1f3   : > { %v1034_v5 = vadd.f32 %v2369_v4, %v1033_v28 }
 0x1f5   : > { %v1050_v8 = vmax.f32 %v1034_v5, 0.0 }
 0x1f7   : > { %1058 = vst.msk [vmem:[#allocation3 + $0x19] sm:$0xff] %vm335_vm9, %v1050_v8 }
 0x1fa   : > { %v1035_v52 = vpop.f32.mrf.mxu3 }
 0x1fb   : > { %v1036_v63 = vadd.f32 %v2369_v4, %v1035_v52 }
 0x1fd   : > { %v1051_v10 = vmax.f32 %v1036_v63, 0.0 }
 0x1fe   : > { %v1415_v35 = vld [vmem:[#allocation3 + $0x19] sm:$0xff] }
 0x1ff   : > { %1059 = vst.msk [vmem:[#allocation3 + $0x21] sm:$0xff] %vm335_vm9, %v1051_v10 }
 0x204   : > { %v1038_v7 = vpop.f32.mrf.mxu3 }
 0x205   : > { %v1039_v39 = vadd.f32 %v2369_v4, %v1038_v7 }
 0x206   : > { %v2379_v13 = vld [vmem:[#allocation3 + $0x20] sm:$0xff] }
 0x207   : > { %v1052_v14 = vmax.f32 %v1039_v39, 0.0  ;;  %v1076_v38 = vsel %vm1989_vm6, %v2379_v13, 0.0  ;;  %v1416_v63 = vld [vmem:[#allocation3 + $0x21] sm:$0xff]  ;;  %v1205_v53 = vsel %vm1921_vm3, %v2379_v13, 0.0 }
 0x208   : > { %1084 = vst.msk [vmem:[#allocation5 + $0x20] sm:$0xff] %vm335_vm9, %v1076_v38  ;;  %v1464_v7 = vld [vmem:[#allocation3 + $0x1a] sm:$0xff] }
 0x209   : > { %1060 = vst.msk [vmem:[#allocation3 + $0x29] sm:$0xff] %vm335_vm9, %v1052_v14  ;;  %v1472_v39 = vsel %vm2774_vm0, %v1464_v7, 0.0  ;;  %v1148_v46 = vsel %vm2777_vm12, %v1464_v7, 0.0  ;;  %v1310_v16 = vsel %vm2775_vm11, %v1464_v7, 0.0 }
 0x20c   : > { %v1040_v36 = vpop.f32.mrf.mxu3 }
 0x20d   : > { %v1041_v55 = vadd.f32 %v2369_v4, %v1040_v36  ;;  %v1072_v36 = vsel %vm2118_vm13, %v1064_v49, 0.0 }
 0x20e   : > { %1080 = vst.msk [vmem:[#allocation5] sm:$0xff] %vm335_vm9, %v1072_v36 }
 0x20f   : > { %v1053_v15 = vmax.f32 %v1041_v55, 0.0  ;;  %v1105_v55 = vpop.permute.xlu2 %1104 }
 0x210   : > { %v2387_v21 = vld [vmem:[#allocation3 + $0x28] sm:$0xff] }
 0x211   : > { %1061 = vst.msk [vmem:[#allocation3 + $0x31] sm:$0xff] %vm335_vm9, %v1053_v15  ;;  %v1077_v51 = vsel %vm1982_vm5, %v2387_v21, 0.0  ;;  %v1417_v15 = vld [vmem:[#allocation3 + $0x29] sm:$0xff] }
 0x212   : > { %1085 = vst.msk [vmem:[#allocation5 + $0x28] sm:$0xff] %vm335_vm9, %v1077_v51  ;;  %v1367_v51 = vsel %vm1961_vm4, %v2379_v13, 0.0 }
 0x215   : > { %v1028_v12 = vpop.f32.mrf.mxu0 }
 0x216   : > { %v1029_v24 = vadd.f32 %v2369_v4, %v1028_v12  ;;  %v1206_v12 = vsel %vm1989_vm6, %v2387_v21, 0.0 }
 0x218   : > { %v1048_v9 = vmax.f32 %v1029_v24, 0.0  ;;  %v2395_v25 = vld [vmem:[#allocation3 + $0x30] sm:$0xff]  ;;  %v1303_v24 = vld [vmem:[#allocation3 + $0x22] sm:$0xff] }
 0x219   : > { %v1078_v19 = vsel %vm2005_vm8, %v2395_v25, 0.0  ;;  %v1311_v30 = vsel %vm2777_vm12, %v1303_v24, 0.0  ;;  %v1304_v13 = vld [vmem:[#allocation3 + $0x2a] sm:$0xff] }
 0x21a   : > { %1056 = vst.msk [vmem:[#allocation3 + $0x9] sm:$0xff] %vm335_vm9, %v1048_v9  ;;  %v1207_v9 = vsel %vm1982_vm5, %v2395_v25, 0.0 }
 0x21b   : > { %1086 = vst.msk [vmem:[#allocation5 + $0x30] sm:$0xff] %vm335_vm9, %v1078_v19 }
 0x21d   : > { %v1030_v26 = vpop.f32.mrf.mxu0 }
 0x21e   : > { %v1031_v27 = vadd.f32 %v2369_v4, %v1030_v26 }
 0x220   : > { %v1049_v6 = vmax.f32 %v1031_v27, 0.0  ;;  %v1473_v27 = vsel %vm2775_vm11, %v1303_v24, 0.0 }
 0x221   : > { %v1089_v20 = vld [vmem:[#allocation3 + $0x9] sm:$0xff] }
 0x222   : > { %v1137_v31 = vld [vmem:[#allocation3 + $0x2] sm:$0xff]  ;;  %1057 = vst.msk [vmem:[#allocation3 + $0x11] sm:$0xff] %vm335_vm9, %v1049_v6  ;;  %1106 = vrot.lane.b32.xlu0 %v1089_v20, %s1835_s28  ;;  %1267 = vrot.lane.b32.xlu2 %v1089_v20, %s1837_s30  ;;  %v1368_v20 = vsel %vm1921_vm3, %v2387_v21, 0.0 }
 0x223   : > { %v1194_v32 = vld [vmem:[#allocation3 + $0x8] sm:$0xff]  ;;  %v1145_v59 = vsel %vm2158_vm15, %v1137_v31, 0.0  ;;  %v1474_v31 = vsel %vm2777_vm12, %v1304_v13, 0.0 }
 0x224   : > { %v1073_v23 = vsel %vm1999_vm7, %v1194_v32, 0.0  ;;  %1161 = vrot.lane.b32.xlu1 %v1145_v59, %s1833_s26  ;;  %v1202_v34 = vsel %vm2118_vm13, %v1194_v32, 0.0  ;;  %v1256_v32 = vld [vmem:[#allocation3 + $0x31] sm:$0xff] }
 0x225   : > { %1081 = vst.msk [vmem:[#allocation5 + $0x8] sm:$0xff] %vm335_vm9, %v1073_v23 }
 0x229   : > { %v1357_v40 = vld [vmem:[#allocation3 + $0x10] sm:$0xff]  ;;  %v1196_v42 = vld [vmem:[#allocation3 + $0x18] sm:$0xff] }
 0x22a   : > { %1218 = vrot.lane.b32.xlu0 %v1202_v34, %s1839_s7  ;;  %1432 = vrot.lane.b32.xlu2 %v1415_v35, %s1840_s16  ;;  %v1075_v48 = vsel %vm1921_vm3, %v1196_v42, 0.0  ;;  %v1074_v37 = vsel %vm1961_vm4, %v1357_v40, 0.0  ;;  %v1252_v50 = vld [vmem:[#allocation3 + $0x11] sm:$0xff]  ;;  %v1365_v44 = vsel %vm2118_vm13, %v1357_v40, 0.0  ;;  %v1203_v2 = vsel %vm1999_vm7, %v1357_v40, 0.0 }
 0x22b   : > { %1083 = vst.msk [vmem:[#allocation5 + $0x18] sm:$0xff] %vm335_vm9, %v1075_v48  ;;  %v1138_v45 = vld [vmem:[#allocation3 + $0xa] sm:$0xff]  ;;  %v1139_v0 = vld [vmem:[#allocation3 + $0x12] sm:$0xff]  ;;  %v1204_v14 = vsel %vm1961_vm4, %v1196_v42, 0.0  ;;  %v1366_v38 = vsel %vm1999_vm7, %v1196_v42, 0.0  ;;  %vm2778_vm4 = vnez %v2730_v3  ;;  %vm2779_vm3 = vnez %v2732_v11 }
 0x22c   : > { %1271 = vrot.lane.b32.xlu1 %v1415_v35, %s1837_s30  ;;  %1082 = vst.msk [vmem:[#allocation5 + $0x10] sm:$0xff] %vm335_vm9, %v1074_v37  ;;  %v1146_v54 = vsel %vm2774_vm0, %v1138_v45, 0.0  ;;  %v1147_v29 = vsel %vm2775_vm11, %v1139_v0, 0.0  ;;  %v1309_v1 = vsel %vm2774_vm0, %v1139_v0, 0.0  ;;  %v1471_v10 = vsel %vm2158_vm15, %v1139_v0, 0.0 }
 0x22d   : > { %v1149_v19 = vsel %vm2778_vm4, %v1303_v24, 0.0  ;;  %v1312_v26 = vsel %vm2778_vm4, %v1304_v13, 0.0  ;;  %v1150_v23 = vsel %vm2779_vm3, %v1304_v13, 0.0  ;;  %vm1185_vm7 = vcmask 195712   ;;  %v1421_v24 = vld [vmem:[#allocation3 + $0x49] sm:$0xff] }
 0x22e   : > { %v1369_v37 = vsel %vm1989_vm6, %v2395_v25, 0.0  ;;  %vm1242_vm13 = vcmask 261312   ;;  %v1562_v25 = vunpack.c.l.b16 %v1540_v41  ;;  %vm2780_vm6 = vnez %v2740_v60 }
 0x22f   : > { %vm1511_vm0 = vcmask 589312   ;;  %vm1572_vm11 = vcmask 588800  }
 0x232   : > { %1269 = vrot.lane.b32.xlu0 %v1252_v50, %s1837_s30  ;;  %1110 = vrot.lane.b32.xlu2 %v1415_v35, %s1835_s28 }
 0x234   : > { %1430 = vrot.lane.b32.xlu1 %v1252_v50, %s1840_s16 }
 0x23a   : > { %1381 = vrot.lane.b32.xlu0 %v1365_v44, %s1841_s17  ;;  %1163 = vrot.lane.b32.xlu2 %v1146_v54, %s1833_s26 }
 0x23b   : > { %v1043_v58 = vpop.f32.mrf.mxu3 }
 0x23c   : > { %1108 = vrot.lane.b32.xlu1 %v1252_v50, %s1835_s28  ;;  %v1044_v61 = vadd.f32 %v2369_v4, %v1043_v58  ;;  %v1567_v58 = vpack.c.b16 %v1562_v25, %v1562_v25 }
 0x23e   : > { %v1054_v33 = vmax.f32 %v1044_v61, 0.0 }
 0x240   : > { %1062 = vst.msk [vmem:[#allocation3 + $0x39] sm:$0xff] %vm335_vm9, %v1054_v33 }
 0x242   : > { %1165 = vrot.lane.b32.xlu0 %v1147_v29, %s1833_s26  ;;  %1326 = vrot.lane.b32.xlu2 %v1309_v1, %s1842_s20 }
 0x243   : > { %v1045_v28 = vpop.f32.mrf.mxu3 }
 0x244   : > { %1220 = vrot.lane.b32.xlu1 %v1203_v2, %s1839_s7  ;;  %v1046_v5 = vadd.f32 %v2369_v4, %v1045_v28  ;;  %v1308_v4 = vsel %vm2158_vm15, %v1138_v45, 0.0  ;;  %vm1128_vm15 = vcmask 130112   ;;  %v1769_v2 = vld [vmem:[%s2685_s3 + $0x18] sm:$0xff] }
 0x245   : > { %1129 = vst.msk [vmem:[#allocation5] sm:$0xff] %vm1128_vm15, %v1105_v55 }
 0x246   : > { %v1055_v8 = vmax.f32 %v1046_v5, 0.0 }
 0x247   : > { %v2445_v52 = vld [vmem:[#allocation3 + $0x38] sm:$0xff] }
 0x248   : > { %1063 = vst.msk [vmem:[#allocation3 + $0x41] sm:$0xff] %vm335_vm9, %v1055_v8  ;;  %v1079_v22 = vsel %vm2776_vm10, %v2445_v52, 0.0  ;;  %v1095_v62 = vld [vmem:[#allocation3 + $0x39] sm:$0xff]  ;;  %v1208_v42 = vsel %vm2005_vm8, %v2445_v52, 0.0  ;;  %v1370_v48 = vsel %vm1982_vm5, %v2445_v52, 0.0  ;;  %vm1585_vm5 = vcmask 1043456  }
 0x249   : > { %1087 = vst.msk [vmem:[#allocation5 + $0x38] sm:$0xff] %vm335_vm9, %v1079_v22  ;;  %v1305_v56 = vld [vmem:[#allocation3 + $0x32] sm:$0xff]  ;;  %vm1291_vm9 = vcmask 326912   ;;  %v1587_v29 = vsel %vm1585_vm5, %v1567_v58, 0 }
 0x24a   : > { %1434 = vrot.lane.b32.xlu0 %v1416_v63, %s1840_s16  ;;  %1487 = vrot.lane.b32.xlu2 %v1471_v10, %s1843_s21  ;;  %v1313_v21 = vsel %vm2779_vm3, %v1305_v56, 0.0  ;;  %v1475_v43 = vsel %vm2778_vm4, %v1305_v56, 0.0  ;;  %v1151_v5 = vsel %vm2780_vm6, %v1305_v56, 0.0  ;;  %v1768_v52 = vld [vmem:[%s2685_s3 + $0x10] sm:$0xff]  ;;  %v1767_v22 = vld [vmem:[%s2685_s3 + $0x8] sm:$0xff] }
 0x24b   : > { %1592 = vmatpush.bf16.msra.mxu1 %v1587_v29  ;;  %1773 = vmatpush.bf16.msra.mxu2 %v1587_v29 }
 0x24c   : > { %1324 = vrot.lane.b32.xlu1 %v1308_v4, %s1842_s20 }
 0x24f   : > { %v1258_v54 = vld [vmem:[#allocation3 + $0x41] sm:$0xff]  ;;  %1593 = vmatpush.bf16.msra.mxu1 %v1769_v2  ;;  %1774 = vmatpush.bf16.msra.mxu2 %v1769_v2 }
 0x250   : > { %v1468_v1 = vld [vmem:[#allocation3 + $0x3a] sm:$0xff]  ;;  %v1307_v36 = vld [vmem:[#allocation3 + $0x42] sm:$0xff] }
 0x251   : > { %v1201_v3 = vld [vmem:[#allocation3 + $0x40] sm:$0xff]  ;;  %v1476_v28 = vsel %vm2779_vm3, %v1468_v1, 0.0  ;;  %v1152_v4 = vsel %vm2781_vm2, %v1468_v1, 0.0  ;;  %v1314_v7 = vsel %vm2780_vm6, %v1468_v1, 0.0  ;;  %v1315_v55 = vsel %vm2781_vm2, %v1307_v36, 0.0 }
 0x252   : > { %1489 = vrot.lane.b32.xlu0 %v1472_v39, %s1843_s21  ;;  %1222 = vrot.lane.b32.xlu2 %v1204_v14, %s1839_s7  ;;  %v1209_v8 = vsel %vm2776_vm10, %v1201_v3, 0.0  ;;  %v1766_v39 = vld [vmem:[%s2685_s3] sm:$0xff] }
 0x253   : > { %1594 = vmatpush.bf16.msra.mxu1 %v1768_v52  ;;  %1775 = vmatpush.bf16.msra.mxu2 %v1768_v52 }
 0x254   : > { %1383 = vrot.lane.b32.xlu1 %v1366_v38, %s1841_s17 }
 0x257   : > { %1595 = vmatpush.bf16.msra.mxu1 %v1767_v22  ;;  %1776 = vmatpush.bf16.msra.mxu2 %v1767_v22 }
 0x25a   : > { %1224 = vrot.lane.b32.xlu0 %v1205_v53, %s1839_s7  ;;  %1112 = vrot.lane.b32.xlu2 %v1416_v63, %s1835_s28  ;;  %v1364_v53 = vld [vmem:[#allocation3 + $0x48] sm:$0xff] }
 0x25b   : > { %1596 = vmatpush.bf16.msra.mxu1 %v1766_v39  ;;  %1777 = vmatpush.bf16.msra.mxu2 %v1766_v39 }
 0x25c   : > { %1167 = vrot.lane.b32.xlu1 %v1148_v46, %s1833_s26  ;;  %v1371_v46 = vsel %vm2005_vm8, %v1201_v3, 0.0  ;;  %vm1405_vm8 = vcmask 458112  }
 0x262   : > { %1328 = vrot.lane.b32.xlu0 %v1310_v16, %s1842_s20  ;;  %1273 = vrot.lane.b32.xlu2 %v1416_v63, %s1837_s30  ;;  %v1372_v16 = vsel %vm2776_vm10, %v1364_v53, 0.0  ;;  %vm1658_vm10 = vcmask 523264  }
 0x264   : > { %1436 = vrot.lane.b32.xlu1 %v1417_v15, %s1840_s16 }
 0x26a   : > { %1114 = vrot.lane.b32.xlu0 %v1417_v15, %s1835_s28  ;;  %1385 = vrot.lane.b32.xlu2 %v1367_v51, %s1841_s17  ;;  %v1470_v51 = vld [vmem:[#allocation3 + $0x4a] sm:$0xff] }
 0x26b   : > { %v1478_v17 = vsel %vm2781_vm2, %v1470_v51, 0.0 }
 0x26c   : > { %1226 = vrot.lane.b32.xlu1 %v1206_v12, %s1839_s7 }
 0x272   : > { %1275 = vrot.lane.b32.xlu0 %v1417_v15, %s1837_s30  ;;  %1228 = vrot.lane.b32.xlu2 %v1207_v9, %s1839_s7  ;;  %v1477_v9 = vsel %vm2780_vm6, %v1307_v36, 0.0 }
 0x274   : > { %1330 = vrot.lane.b32.xlu1 %v1311_v30, %s1842_s20 }
 0x27a   : > { %1169 = vrot.lane.b32.xlu0 %v1149_v19, %s1833_s26  ;;  %1332 = vrot.lane.b32.xlu2 %v1312_v26, %s1842_s20 }
 0x27c   : > { %1491 = vrot.lane.b32.xlu1 %v1473_v27, %s1843_s21  ;;  %v1268_v6 = vpop.permute.xlu2 %1267 }
 0x282   : > { %1387 = vrot.lane.b32.xlu0 %v1368_v20, %s1841_s17  ;;  %1493 = vrot.lane.b32.xlu2 %v1474_v31, %s1843_s21 }
 0x284   : > { %1277 = vrot.lane.b32.xlu1 %v1256_v32, %s1837_s30  ;;  %v2519_v59 = vpop.permute.xlu2 %1432 }
 0x28a   : > { %1438 = vrot.lane.b32.xlu0 %v1256_v32, %s1840_s16  ;;  %1118 = vrot.lane.b32.xlu2 %v1095_v62, %s1835_s28 }
 0x28c   : > { %1116 = vrot.lane.b32.xlu1 %v1256_v32, %s1835_s28  ;;  %v1111_v18 = vpop.permute.xlu2 %1110 }
 0x28d   : > { %1132 = vst.msk [vmem:[#allocation5 + $0x18] sm:$0xff] %vm1128_vm15, %v1111_v18 }
 0x292   : > { %1334 = vrot.lane.b32.xlu0 %v1313_v21, %s1842_s20  ;;  %1279 = vrot.lane.b32.xlu2 %v1095_v62, %s1837_s30 }
 0x294   : > { %1171 = vrot.lane.b32.xlu1 %v1150_v23, %s1833_s26  ;;  %v1107_v34 = vpop.permute.xlu0 %1106  ;;  %v1164_v35 = vpop.permute.xlu2 %1163 }
 0x295   : > { %1130 = vst.msk [vmem:[#allocation5 + $0x8] sm:$0xff] %vm1128_vm15, %v1107_v34 }
 0x296   : > { %v1162_v40 = vpop.permute.xlu1 %1161  ;;  %1187 = vst.msk [vmem:[#allocation5 + $0x8] sm:$0xff] %vm1185_vm7, %v1164_v35 }
 0x297   : > { %1186 = vst.msk [vmem:[#allocation5] sm:$0xff] %vm1185_vm7, %v1162_v40 }
 0x29a   : > { %1230 = vrot.lane.b32.xlu0 %v1208_v42, %s1839_s7  ;;  %1391 = vrot.lane.b32.xlu2 %v1370_v48, %s1841_s17 }
 0x29c   : > { %1389 = vrot.lane.b32.xlu1 %v1369_v37, %s1841_s17  ;;  %v1219_v50 = vpop.permute.xlu0 %1218  ;;  %v2547_v45 = vpop.permute.xlu2 %1326 }
 0x29d   : > { %1243 = vst.msk [vmem:[#allocation5] sm:$0xff] %vm1242_vm13, %v1219_v50 }
 0x29e   : > { %v1272_v44 = vpop.permute.xlu1 %1271  ;;  %1292 = vst.msk [vmem:[#allocation5] sm:$0xff] %vm1291_vm9, %v1268_v6 }
 0x2a2   : > { %1281 = vrot.lane.b32.xlu0 %v1258_v54, %s1837_s30  ;;  %1495 = vrot.lane.b32.xlu2 %v1475_v43, %s1843_s21 }
 0x2a4   : > { %1440 = vrot.lane.b32.xlu1 %v1095_v62, %s1840_s16  ;;  %v1270_v61 = vpop.permute.xlu0 %1269  ;;  %v2559_v33 = vpop.permute.xlu2 %1487 }
 0x2a6   : > { %v2561_v0 = vpop.permute.xlu1 %1430 }
 0x2aa   : > { %1497 = vrot.lane.b32.xlu0 %v1476_v28, %s1843_s21  ;;  %1173 = vrot.lane.b32.xlu2 %v1151_v5, %s1833_s26 }
 0x2ac   : > { %1232 = vrot.lane.b32.xlu1 %v1209_v8, %s1839_s7  ;;  %v1382_v63 = vpop.permute.xlu0 %1381  ;;  %v1223_v11 = vpop.permute.xlu2 %1222 }
 0x2ae   : > { %v1109_v10 = vpop.permute.xlu1 %1108 }
 0x2af   : > { %1131 = vst.msk [vmem:[#allocation5 + $0x10] sm:$0xff] %vm1128_vm15, %v1109_v10 }
 0x2b2   : > { %1175 = vrot.lane.b32.xlu0 %v1152_v4, %s1833_s26  ;;  %1442 = vrot.lane.b32.xlu2 %v1258_v54, %s1840_s16 }
 0x2b4   : > { %1336 = vrot.lane.b32.xlu1 %v1314_v7, %s1842_s20  ;;  %v1166_v14 = vpop.permute.xlu0 %1165  ;;  %v1113_v38 = vpop.permute.xlu2 %1112 }
 0x2b5   : > { %1188 = vst.msk [vmem:[#allocation5 + $0x10] sm:$0xff] %vm1185_vm7, %v1166_v14 }
 0x2b6   : > { %v1221_v49 = vpop.permute.xlu1 %1220  ;;  %1245 = vst.msk [vmem:[#allocation5 + $0x10] sm:$0xff] %vm1242_vm13, %v1223_v11 }
 0x2b7   : > { %1133 = vst.msk [vmem:[#allocation5 + $0x20] sm:$0xff] %vm1128_vm15, %v1113_v38 }
 0x2b8   : > { %1244 = vst.msk [vmem:[#allocation5 + $0x8] sm:$0xff] %vm1242_vm13, %v1221_v49 }
 0x2b9   : > { %1293 = vst.msk [vmem:[#allocation5 + $0x8] sm:$0xff] %vm1291_vm9, %v1270_v61 }
 0x2ba   : > { %1294 = vst.msk [vmem:[#allocation5 + $0x10] sm:$0xff] %vm1291_vm9, %v1272_v44  ;;  %1393 = vrot.lane.b32.xlu0 %v1371_v46, %s1841_s17  ;;  %1338 = vrot.lane.b32.xlu2 %v1315_v55, %s1842_s20  ;;  %v1821_v46 = vld [vmem:[%s2686_s4] ss:$0 sm:$0xff] }
 0x2bb   : > { %1350 = vst.msk [vmem:[#allocation5 + $0x8] sm:$0xff] %vm1348_vm1, %v2547_v45 }
 0x2bc   : > { %1395 = vrot.lane.b32.xlu1 %v1372_v16, %s1841_s17  ;;  %v1435_v15 = vpop.permute.xlu0 %1434  ;;  %v1274_v47 = vpop.permute.xlu2 %1273 }
 0x2be   : > { %v1325_v12 = vpop.permute.xlu1 %1324 }
 0x2bf   : > { %1349 = vst.msk [vmem:[#allocation5] sm:$0xff] %vm1348_vm1, %v1325_v12 }
 0x2c0   : > { %1406 = vst.msk [vmem:[#allocation5] sm:$0xff] %vm1405_vm8, %v1382_v63 }
 0x2c1   : > { %1455 = vst.msk [vmem:[#allocation5] sm:$0xff] %vm1454_vm14, %v2561_v0 }
 0x2c2   : > { %1512 = vst.msk [vmem:[#allocation5] sm:$0xff] %vm1511_vm0, %v2559_v33  ;;  %1444 = vrot.lane.b32.xlu0 %v1421_v24, %s1840_s16  ;;  %1501 = vrot.lane.b32.xlu2 %v1478_v17, %s1843_s21 }
 0x2c4   : > { %1499 = vrot.lane.b32.xlu1 %v1477_v9, %s1843_s21  ;;  %v1490_v30 = vpop.permute.xlu0 %1489  ;;  %v1386_v13 = vpop.permute.xlu2 %1385 }
 0x2c6   : > { %v1384_v19 = vpop.permute.xlu1 %1383 }
 0x2c7   : > { %1407 = vst.msk [vmem:[#allocation5 + $0x8] sm:$0xff] %vm1405_vm8, %v1384_v19 }
 0x2c8   : > { %1456 = vst.msk [vmem:[#allocation5 + $0x8] sm:$0xff] %vm1454_vm14, %v2519_v59 }
 0x2c9   : > { %1513 = vst.msk [vmem:[#allocation5 + $0x8] sm:$0xff] %vm1511_vm0, %v1490_v30  ;;  %v1520_v60 = vld [vmem:[#allocation5] sm:$0xff] }
 0x2cc   : > { %v1225_v57 = vpop.permute.xlu0 %1224  ;;  %v1229_v26 = vpop.permute.xlu2 %1228 }
 0x2ce   : > { %v1168_v27 = vpop.permute.xlu1 %1167 }
 0x2cf   : > { %1189 = vst.msk [vmem:[#allocation5 + $0x18] sm:$0xff] %vm1185_vm7, %v1168_v27 }
 0x2d0   : > { %1246 = vst.msk [vmem:[#allocation5 + $0x18] sm:$0xff] %vm1242_vm13, %v1225_v57  ;;  %v1521_v6 = vld [vmem:[#allocation5 + $0x8] sm:$0xff] }
 0x2d1   : > { %1295 = vst.msk [vmem:[#allocation5 + $0x18] sm:$0xff] %vm1291_vm9, %v1274_v47  ;;  %v1528_v20 = vpack.c.bf16 %v1521_v6, %v1520_v60 }
 0x2d3   : > { %1757 = vmatmul.msk.bf16.vlgmr.msra.gmra.mxu1 %vm1572_vm11, %v1528_v20 }
 0x2d4   : > { %v1329_v31 = vpop.permute.xlu0 %1328  ;;  %v1333_v32 = vpop.permute.xlu2 %1332 }
 0x2d5   : > { %1351 = vst.msk [vmem:[#allocation5 + $0x10] sm:$0xff] %vm1348_vm1, %v1329_v31 }
 0x2d6   : > { %v1437_v59 = vpop.permute.xlu1 %1436  ;;  %1408 = vst.msk [vmem:[#allocation5 + $0x10] sm:$0xff] %vm1405_vm8, %v1386_v13 }
 0x2d7   : > { %1457 = vst.msk [vmem:[#allocation5 + $0x10] sm:$0xff] %vm1454_vm14, %v1435_v15 }
 0x2dc   : > { %v1115_v62 = vpop.permute.xlu0 %1114  ;;  %v1494_v18 = vpop.permute.xlu2 %1493 }
 0x2dd   : > { %1134 = vst.msk [vmem:[#allocation5 + $0x28] sm:$0xff] %vm1128_vm15, %v1115_v62 }
 0x2de   : > { %v1227_v56 = vpop.permute.xlu1 %1226 }
 0x2e4   : > { %v1276_v21 = vpop.permute.xlu0 %1275  ;;  %v1119_v23 = vpop.permute.xlu2 %1118 }
 0x2e5   : > { %1136 = vst.msk [vmem:[#allocation5 + $0x38] sm:$0xff] %vm1128_vm15, %v1119_v23 }
 0x2e6   : > { %v1331_v34 = vpop.permute.xlu1 %1330 }
 0x2e7   : > { %1352 = vst.msk [vmem:[#allocation5 + $0x18] sm:$0xff] %vm1348_vm1, %v1331_v34 }
 0x2ec   : > { %v1170_v35 = vpop.permute.xlu0 %1169  ;;  %v1280_v40 = vpop.permute.xlu2 %1279 }
 0x2ed   : > { %1190 = vst.msk [vmem:[#allocation5 + $0x20] sm:$0xff] %vm1185_vm7, %v1170_v35 }
 0x2ee   : > { %v1492_v42 = vpop.permute.xlu1 %1491  ;;  %1247 = vst.msk [vmem:[#allocation5 + $0x20] sm:$0xff] %vm1242_vm13, %v1227_v56 }
 0x2ef   : > { %1296 = vst.msk [vmem:[#allocation5 + $0x20] sm:$0xff] %vm1291_vm9, %v1276_v21 }
 0x2f0   : > { %1353 = vst.msk [vmem:[#allocation5 + $0x20] sm:$0xff] %vm1348_vm1, %v1333_v32 }
 0x2f1   : > { %1514 = vst.msk [vmem:[#allocation5 + $0x10] sm:$0xff] %vm1511_vm0, %v1492_v42 }
 0x2f4   : > { %v1388_v48 = vpop.permute.xlu0 %1387  ;;  %v1392_v37 = vpop.permute.xlu2 %1391 }
 0x2f5   : > { %1409 = vst.msk [vmem:[#allocation5 + $0x18] sm:$0xff] %vm1405_vm8, %v1388_v48 }
 0x2f6   : > { %v1278_v50 = vpop.permute.xlu1 %1277  ;;  %1458 = vst.msk [vmem:[#allocation5 + $0x18] sm:$0xff] %vm1454_vm14, %v1437_v59 }
 0x2f7   : > { %1515 = vst.msk [vmem:[#allocation5 + $0x18] sm:$0xff] %vm1511_vm0, %v1494_v18 }
 0x2f8   : > { %v1522_v54 = vld [vmem:[#allocation5 + $0x10] sm:$0xff] }
 0x2fc   : > { %v1439_v45 = vpop.permute.xlu0 %1438  ;;  %v1496_v44 = vpop.permute.xlu2 %1495 }
 0x2fe   : > { %v1117_v41 = vpop.permute.xlu1 %1116  ;;  %v1523_v43 = vld [vmem:[#allocation5 + $0x18] sm:$0xff] }
 0x2ff   : > { %1135 = vst.msk [vmem:[#allocation5 + $0x30] sm:$0xff] %vm1128_vm15, %v1117_v41  ;;  %v1529_v25 = vpack.c.bf16 %v1523_v43, %v1522_v54 }
 0x301   : > { %1758 = vmatmul.msk.bf16.gmra.mxu1 %vm1572_vm11, %v1529_v25 }
 0x304   : > { %v1335_v58 = vpop.permute.xlu0 %1334  ;;  %v1174_v61 = vpop.permute.xlu2 %1173 }
 0x305   : > { %1192 = vst.msk [vmem:[#allocation5 + $0x30] sm:$0xff] %vm1185_vm7, %v1174_v61 }
 0x306   : > { %v1172_v33 = vpop.permute.xlu1 %1171 }
 0x307   : > { %1191 = vst.msk [vmem:[#allocation5 + $0x28] sm:$0xff] %vm1185_vm7, %v1172_v33 }
 0x308   : > { %1248 = vst.msk [vmem:[#allocation5 + $0x28] sm:$0xff] %vm1242_vm13, %v1229_v26 }
 0x309   : > { %1297 = vst.msk [vmem:[#allocation5 + $0x28] sm:$0xff] %vm1291_vm9, %v1278_v50 }
 0x30a   : > { %1354 = vst.msk [vmem:[#allocation5 + $0x28] sm:$0xff] %vm1348_vm1, %v1335_v58 }
 0x30b   : > { %1411 = vst.msk [vmem:[#allocation5 + $0x28] sm:$0xff] %vm1405_vm8, %v1392_v37 }
 0x30c   : > { %v1231_v0 = vpop.permute.xlu0 %1230  ;;  %v1443_v5 = vpop.permute.xlu2 %1442 }
 0x30d   : > { %1249 = vst.msk [vmem:[#allocation5 + $0x30] sm:$0xff] %vm1242_vm13, %v1231_v0 }
 0x30e   : > { %v1390_v29 = vpop.permute.xlu1 %1389  ;;  %1298 = vst.msk [vmem:[#allocation5 + $0x30] sm:$0xff] %vm1291_vm9, %v1280_v40 }
 0x30f   : > { %1410 = vst.msk [vmem:[#allocation5 + $0x20] sm:$0xff] %vm1405_vm8, %v1390_v29 }
 0x310   : > { %1459 = vst.msk [vmem:[#allocation5 + $0x20] sm:$0xff] %vm1454_vm14, %v1439_v45 }
 0x311   : > { %1516 = vst.msk [vmem:[#allocation5 + $0x20] sm:$0xff] %vm1511_vm0, %v1496_v44 }
 0x314   : > { %v1282_v1 = vpop.permute.xlu0 %1281  ;;  %v1339_v22 = vpop.permute.xlu2 %1338 }
 0x316   : > { %v1441_v3 = vpop.permute.xlu1 %1440 }
 0x317   : > { %1460 = vst.msk [vmem:[#allocation5 + $0x28] sm:$0xff] %vm1454_vm14, %v1441_v3 }
 0x318   : > { %v1524_v52 = vld [vmem:[#allocation5 + $0x20] sm:$0xff] }
 0x31c   : > { %v1498_v2 = vpop.permute.xlu0 %1497  ;;  %v1502_v14 = vpop.permute.xlu2 %1501 }
 0x31d   : > { %1517 = vst.msk [vmem:[#allocation5 + $0x28] sm:$0xff] %vm1511_vm0, %v1498_v2 }
 0x31e   : > { %v1233_v28 = vpop.permute.xlu1 %1232 }
 0x324   : > { %v1176_v8 = vpop.permute.xlu0 %1175  ;;  %v1525_v63 = vld [vmem:[#allocation5 + $0x28] sm:$0xff] }
 0x325   : > { %1193 = vst.msk [vmem:[#allocation5 + $0x38] sm:$0xff] %vm1185_vm7, %v1176_v8  ;;  %v1530_v10 = vpack.c.bf16 %v1525_v63, %v1524_v52 }
 0x326   : > { %v1337_v11 = vpop.permute.xlu1 %1336  ;;  %1250 = vst.msk [vmem:[#allocation5 + $0x38] sm:$0xff] %vm1242_vm13, %v1233_v28 }
 0x327   : > { %1299 = vst.msk [vmem:[#allocation5 + $0x38] sm:$0xff] %vm1291_vm9, %v1282_v1  ;;  %1759 = vmatmul.msk.bf16.vlgmr.msra.gmra.mxu2 %vm1572_vm11, %v1530_v10 }
 0x328   : > { %1355 = vst.msk [vmem:[#allocation5 + $0x30] sm:$0xff] %vm1348_vm1, %v1337_v11 }
 0x329   : > { %1356 = vst.msk [vmem:[#allocation5 + $0x38] sm:$0xff] %vm1348_vm1, %v1339_v22 }
 0x32c   : > { %v1394_v4 = vpop.permute.xlu0 %1393 }
 0x32d   : > { %1412 = vst.msk [vmem:[#allocation5 + $0x30] sm:$0xff] %vm1405_vm8, %v1394_v4 }
 0x32e   : > { %v1396_v7 = vpop.permute.xlu1 %1395  ;;  %1461 = vst.msk [vmem:[#allocation5 + $0x30] sm:$0xff] %vm1454_vm14, %v1443_v5 }
 0x32f   : > { %1413 = vst.msk [vmem:[#allocation5 + $0x38] sm:$0xff] %vm1405_vm8, %v1396_v7 }
 0x334   : > { %v1445_v39 = vpop.permute.xlu0 %1444 }
 0x335   : > { %1462 = vst.msk [vmem:[#allocation5 + $0x38] sm:$0xff] %vm1454_vm14, %v1445_v39 }
 0x336   : > { %v1500_v38 = vpop.permute.xlu1 %1499  ;;  %1519 = vst.msk [vmem:[#allocation5 + $0x38] sm:$0xff] %vm1511_vm0, %v1502_v14 }
 0x337   : > { %1518 = vst.msk [vmem:[#allocation5 + $0x30] sm:$0xff] %vm1511_vm0, %v1500_v38 }
 0x33d   : > { %v1527_v36 = vld [vmem:[#allocation5 + $0x38] sm:$0xff] }
 0x33e   : > { %v1526_v49 = vld [vmem:[#allocation5 + $0x30] sm:$0xff] }
 0x33f   : > { %v1531_v53 = vpack.c.bf16 %v1527_v36, %v1526_v49 }
 0x341   : > { %1760 = vmatmul.msk.bf16.gmra.mxu2 %vm1572_vm11, %v1531_v53 }
 0x350   : > { %v1598_v55 = vpop.f32.mrf.mxu1 }
 0x351   : > { %v1599_v16 = vadd.f32 %v1821_v46, %v1598_v55 }
 0x353   : > { %v1618_v15 = vmax.f32 %v1599_v16, 0.0 }
 0x355   : > { %1626 = vxpose.xlu0.b32.start [1/8] (short) (narrow) %v1618_v15, 8 }
 0x358   : > { %v1600_v47 = vpop.f32.mrf.mxu1 }
 0x359   : > { %v1601_v51 = vadd.f32 %v1821_v46, %v1600_v47 }
 0x35b   : > { %v1619_v12 = vmax.f32 %v1601_v51, 0.0 }
 0x35d   : > { %1627 = vxpose.xlu0.b32.cont [2/8] (short) (narrow) %v1619_v12, 8 }
 0x37e   : > { %v1603_v24 = vpop.f32.mrf.mxu1 }
 0x37f   : > { %v1604_v17 = vadd.f32 %v1821_v46, %v1603_v24 }
 0x381   : > { %v1620_v9 = vmax.f32 %v1604_v17, 0.0 }
 0x383   : > { %1628 = vxpose.xlu0.b32.cont [3/8] (short) (narrow) %v1620_v9, 8 }
 0x386   : > { %v1605_v30 = vpop.f32.mrf.mxu1 }
 0x387   : > { %v1606_v13 = vadd.f32 %v1821_v46, %v1605_v30 }
 0x389   : > { %v1621_v19 = vmax.f32 %v1606_v13, 0.0 }
 0x38b   : > { %1629 = vxpose.xlu0.b32.cont [4/8] (short) (narrow) %v1621_v19, 8 }
 0x3aa   : > { %v1608_v57 = vpop.f32.mrf.mxu2 }
 0x3ab   : > { %v1609_v26 = vadd.f32 %v1821_v46, %v1608_v57 }
 0x3ad   : > { %v1622_v27 = vmax.f32 %v1609_v26, 0.0 }
 0x3af   : > { %1630 = vxpose.xlu0.b32.cont [5/8] (short) (narrow) %v1622_v27, 8 }
 0x3b2   : > { %v1610_v60 = vpop.f32.mrf.mxu2 }
 0x3b3   : > { %v1611_v6 = vadd.f32 %v1821_v46, %v1610_v60 }
 0x3b5   : > { %v1623_v20 = vmax.f32 %v1611_v6, 0.0 }
 0x3b7   : > { %1631 = vxpose.xlu0.b32.cont [6/8] (short) (narrow) %v1623_v20, 8 }
 0x3c4   : > { %v1613_v31 = vpop.f32.mrf.mxu2 }
 0x3c5   : > { %v1614_v32 = vadd.f32 %v1821_v46, %v1613_v31 }
 0x3c7   : > { %v1624_v59 = vmax.f32 %v1614_v32, 0.0 }
 0x3c9   : > { %1632 = vxpose.xlu0.b32.cont [7/8] (short) (narrow) %v1624_v59, 8 }
 0x3cc   : > { %v1615_v62 = vpop.f32.mrf.mxu2 }
 0x3cd   : > { %v1616_v18 = vadd.f32 %v1821_v46, %v1615_v62 }
 0x3cf   : > { %v1625_v56 = vmax.f32 %v1616_v18, 0.0 }
 0x3d1   : > { %1633 = vxpose.xlu0.b32.end [8/8] (short) (narrow) %v1625_v56, 8 }
 0x43d   : > { %v1642_v21 = vpop.trf.xlu0 }
 0x43e   : > { %1659 = vst.msk [vmem:[%s222_s12] sm:$0xff] %vm1658_vm10, %v1642_v21 }
 0x43f PF: > { %s15_s18 = sadd.s32 1, %s1828_s18  }
 0x440   : > { %p12_p4 = scmp.ge.s32.totalorder %s15_s18, 4  }
 0x442   :  { %14 = sbr.rel (!%p12_p4) target bundleno = 1 (0x1), region = 71 }

</bundles_post_ra>
